<compile_context>
chip_gen: v7x
topology: tpu7x:2x2x1
jax: 0.10.0
libtpu: 0.0.40
codegen_flags: <defaults>
</compile_context>

<pallas_src>
import jax
import jax.numpy as jnp
from jax.experimental import pallas as pl
from jax.experimental.pallas import tpu as pltpu

H = 28
W = 28
CIN = 64            # input channels j
CEXP = 128          # expanded lanes c = k*64 + j   (k = stage-A output tap)
COUT = 128          # output channels i
SW = 32             # rows per h-band in the flattened layout (valid w -> cols 1..28)
TH = 7              # output h-rows per grid tile
NT = H // TH        # 4 grid tiles
TM = TH * SW        # 224 output rows per tile
TROWS = (TH + 2) * SW   # 288 stage-A rows per tile (tile + one halo band each side)
G = 8               # guard rows above/below the stage-A scratch
XPAD = 8            # zero apron rows at top/bottom of the flattened input
NXROWS = XPAD + (H + 2) * SW + XPAD   # 976
NYROWS = H * SW                        # 896 output rows (cols 0,29..31 discarded later)

# 3x3 taps: tap = kh*3 + kw, flattened row shift s = (kh-1)*SW + (kw-1)
_TAP_SHIFT = tuple((kh - 1) * SW + (kw - 1) for kh in range(3) for kw in range(3))
# pair taps along the contraction dim (K: 128 -> 256); tap 4 (kh=1,kw=1, shift 0) stays single
TAP_PAIRS = ((0, 2), (3, 5), (6, 8), (1, 7))
TAP_SINGLE = 4


def fused_conv_kernel(x_ref, w2_ref, wp_ref, wl_ref, y_ref, u_ref):
    """One grid step = 7 output h-rows.

    x_ref : (976, 128) f32   flattened, zero-padded input, lanes c = k*64 + j
    w2_ref: (3, 128)   f32   stage-A taps, w2b[i, k*64+j] = W2[j, i, k]
    wp_ref: (4, 256, 128) bf16  paired stage-B weights (two taps stacked along K)
    wl_ref: (128, 128) bf16  stage-B weights for the remaining (kh=1,kw=1) tap
    y_ref : (224, 128) f32   output rows [t*224, (t+1)*224) of the stride-32 layout
    u_ref : (304, 128) f32   scratch: stage-A result (rows 8..295) + 8 guard rows each side
    """
    t = pl.program_id(0)
    xbase = pl.multiple_of(XPAD + t * TM, 8)   # first stage-A row of this tile in x_ref

    # ---- stage A: depthwise 1D conv along W (kernel 3, pad 1) on 128 expanded lanes ----
    xm = x_ref[pl.ds(xbase - 1, TROWS), :]          # x[., w-1]
    x0 = x_ref[pl.ds(xbase,     TROWS), :]          # x[., w  ]
    xp = x_ref[pl.ds(xbase + 1, TROWS), :]          # x[., w+1]
    u = (xm * w2_ref[0:1, :] + x0 * w2_ref[1:2, :] + xp * w2_ref[2:3, :])   # (288, 128) f32

    # zero the W-padding columns of every band (stage A evaluated at padding positions
    # leaks neighbour values; stage B needs true zeros there) -- one row-mask, in-kernel.
    col = jax.lax.broadcasted_iota(jnp.int32, (TROWS, 1), 0) % SW
    u = jnp.where((col >= 1) & (col <= W), u, 0.0)

    # guard bands (read only by discarded output rows) + stage-A result into scratch
    u_ref[pl.ds(0, G), :] = jnp.zeros((G, CEXP), jnp.float32)
    u_ref[pl.ds(G + TROWS, G), :] = jnp.zeros((G, CEXP), jnp.float32)
    u_ref[pl.ds(G, TROWS), :] = u

    # ---- stage B: 3x3 conv as 4 paired (K=256) + 1 (K=128) bf16 MXU matmuls ----
    row0 = G + SW                                    # scratch row of the tile's first output row
    acc = jnp.zeros((TM, COUT), jnp.float32)         # 28 vregs -> register resident
    for pi, (ta, tb) in enumerate(TAP_PAIRS):
        pa = u_ref[pl.ds(row0 + _TAP_SHIFT[ta], TM), :]
        pb = u_ref[pl.ds(row0 + _TAP_SHIFT[tb], TM), :]
        patch = jnp.concatenate([pa, pb], axis=-1).astype(jnp.bfloat16)     # (224, 256)
        acc = acc + jnp.dot(patch, wp_ref[pi], preferred_element_type=jnp.float32)
    pc = u_ref[pl.ds(row0 + _TAP_SHIFT[TAP_SINGLE], TM), :].astype(jnp.bfloat16)
    acc = acc + jnp.dot(pc, wl_ref[...], preferred_element_type=jnp.float32)

    y_ref[...] = acc


def _prep_x(x):
    """(1, 64, 28, 28) NCHW -> (976, 128) flattened stride-32 layout, lanes c = k*64 + j."""
    xh = jnp.transpose(x[0], (1, 2, 0)).astype(jnp.float32)       # (28, 28, 64) [h, w, j]
    xb = jnp.pad(xh, ((1, 1), (1, SW - 1 - W), (0, 0)))           # (30, 32, 64): h halo + w pad
    x2 = jnp.concatenate([xb, xb], axis=-1)                       # (30, 32, 128): duplicate over k
    xf = x2.reshape((H + 2) * SW, CEXP)
    return jnp.pad(xf, ((XPAD, XPAD), (0, 0)))                    # (976, 128)


def _prep_weights(w1, w2):
    """Repack weights for the kernel's lane order c = k*64 + j; stage-B weights in bf16."""
    # stage A: w2b[i, k*64 + j] = w2[j, i, k]
    w2b = jnp.transpose(w2, (1, 2, 0)).reshape(3, CEXP).astype(jnp.float32)
    # stage B: w1f[kh*3+kw, k*64 + j, i] = w1[i, j//2, kh, kw, k]  (pair-sum folded via repeat)
    w1t = jnp.transpose(w1, (2, 3, 4, 1, 0))                      # (kh, kw, k, a, i)
    w1r = jnp.repeat(w1t, 2, axis=3)                              # (kh, kw, k, j, i)
    w1f = w1r.reshape(9, CEXP, COUT).astype(jnp.bfloat16)
    wp = jnp.stack([jnp.concatenate([w1f[a], w1f[b]], axis=0) for a, b in TAP_PAIRS])  # (4,256,128)
    wl = w1f[TAP_SINGLE]                                          # (128, 128)
    return w2b, wp, wl


@jax.jit
def kernel_manual_1_forward(x, w1, w2):
    """x: (1, 64, 28, 28); w1: (128, 32, 3, 3, 2); w2: (64, 3, 2) -> (1, 128, 28, 28)."""
    assert x.shape == (1, CIN, H, W)
    x_pad = _prep_x(x)
    w2b, wp, wl = _prep_weights(w1, w2)

    y_mat = pl.pallas_call(
        fused_conv_kernel,
        out_shape=jax.ShapeDtypeStruct((NYROWS, COUT), jnp.float32),
        grid=(NT,),
        in_specs=[
            pl.BlockSpec((NXROWS, CEXP), lambda t: (0, 0)),        # x: fully resident
            pl.BlockSpec((3, CEXP), lambda t: (0, 0)),             # stage-A weights
            pl.BlockSpec((len(TAP_PAIRS), 2 * CEXP, COUT), lambda t: (0, 0, 0)),  # paired W1
            pl.BlockSpec((CEXP, COUT), lambda t: (0, 0)),          # single-tap W1
        ],
        out_specs=pl.BlockSpec((TM, COUT), lambda t: (t, 0)),
        scratch_shapes=[pltpu.VMEM((G + TROWS + G, CEXP), jnp.float32)],
        compiler_params=pltpu.CompilerParams(
            dimension_semantics=("parallel",)),
    )(x_pad, w2b, wp, wl)

    # (896, 128) -> drop W-padding columns -> (1, 128, 28, 28)  ('niop')
    y = y_mat.reshape(H, SW, COUT)[:, 1:1 + W, :]                  # (28, 28, 128) [h, w, i]
    return jnp.transpose(y, (2, 0, 1))[None]


def reference_forward(x, w1, w2):
    """Pure-JAX mirror of the PyTorch module (unfold semantics expanded explicitly)."""
    xp = jnp.pad(x, ((0, 0), (0, 0), (0, 0), (1, 1)))
    t3 = jnp.stack([xp[..., i:i + W] for i in range(3)], axis=3)       # (1,64,28,3,28)
    t4 = jnp.einsum('ljmin,jik->ljmnk', t3, w2, precision='highest')   # (1,64,28,28,2)
    t5 = t4.reshape(1, 32, 2, H, W, 2).sum(axis=2)                     # (1,32,28,28,2)
    t5p = jnp.pad(t5, ((0, 0), (0, 0), (1, 1), (1, 1), (0, 0)))
    t6 = jnp.stack(
        [jnp.stack([t5p[:, :, a:a + H, b:b + W, :] for b in range(3)], axis=3)
         for a in range(3)], axis=2)                                   # (1,32,3,28,3,28,2)
    return jnp.einsum('nljokpm,iljkm->niop', t6, w1, precision='highest')


if __name__ == "__main__":
    key = jax.random.PRNGKey(0)
    k1, k2, k3 = jax.random.split(key, 3)
    # deterministic stand-ins for torch.randn parameters (shapes from the module __init__)
    w1 = jax.random.normal(k1, (128, 32, 3, 3, 2), dtype=jnp.float32)
    w2 = jax.random.normal(k2, (64, 3, 2), dtype=jnp.float32)
    # input shape is forced by the module's reshape to (1, 1792, 28, 1)  ->  (1, 64, 28, 28)
    x = jax.random.normal(k3, (1, 64, 28, 28), dtype=jnp.float32)

    y = jax.block_until_ready(kernel_manual_1_forward(x, w1, w2))
    y_ref = jax.block_until_ready(reference_forward(x, w1, w2))

    assert y.shape == (1, 128, 28, 28)
    assert y.dtype == jnp.float32
    max_err = float(jnp.max(jnp.abs(y - y_ref)))
    assert jnp.allclose(y, y_ref, atol=0.5, rtol=2e-2), f"max abs err = {max_err}"
    print("KERNEL_OK")
</pallas_src>

<mosaic_0001>
module attributes {stable_mosaic.version = 11 : i64} {
  func.func @fused_conv_kernel(%arg0: i32, %arg1: memref<976x128xf32, #tpu.memory_space<vmem>>, %arg2: memref<3x128xf32, #tpu.memory_space<vmem>>, %arg3: memref<4x256x128xbf16, #tpu.memory_space<vmem>>, %arg4: memref<128x128xbf16, #tpu.memory_space<vmem>>, %arg5: memref<224x128xf32, #tpu.memory_space<vmem>>, %arg6: memref<304x128xf32, #tpu.memory_space<vmem>>) attributes {dimension_semantics = [#tpu.dimension_semantics<parallel>], iteration_bounds = array<i64: 4>, scalar_prefetch = 0 : i64, scratch_operands = 1 : i64, tpu.core_type = #tpu.core_type<tc>, window_params = [{pipeline_mode = #tpu.pipeline_mode<synchronous>, transform_indices = @transform_0, window_bounds = array<i64: 976, 128>}, {pipeline_mode = #tpu.pipeline_mode<synchronous>, transform_indices = @transform_1, window_bounds = array<i64: 3, 128>}, {pipeline_mode = #tpu.pipeline_mode<synchronous>, transform_indices = @transform_2, window_bounds = array<i64: 4, 256, 128>}, {pipeline_mode = #tpu.pipeline_mode<synchronous>, transform_indices = @transform_3, window_bounds = array<i64: 128, 128>}, {transform_indices = @transform_4, window_bounds = array<i64: 224, 128>}]} {
    %c224_i32 = arith.constant 224 : i32
    %0 = arith.muli %arg0, %c224_i32 : i32
    %c8_i32 = arith.constant 8 : i32
    %1 = arith.addi %c8_i32, %0 : i32
    %2 = tpu.assume_multiple %1, 8 : i32
    %c1_i32 = arith.constant 1 : i32
    %3 = arith.subi %2, %c1_i32 : i32
    %4 = arith.index_cast %3 : i32 to index
    %c0 = arith.constant 0 : index
    %5 = vector.load %arg1[%4, %c0] : memref<976x128xf32, #tpu.memory_space<vmem>>, vector<288x128xf32>
    %6 = arith.index_cast %2 : i32 to index
    %c0_0 = arith.constant 0 : index
    %7 = vector.load %arg1[%6, %c0_0] : memref<976x128xf32, #tpu.memory_space<vmem>>, vector<288x128xf32>
    %c1_i32_1 = arith.constant 1 : i32
    %8 = arith.addi %2, %c1_i32_1 : i32
    %9 = arith.index_cast %8 : i32 to index
    %c0_2 = arith.constant 0 : index
    %10 = vector.load %arg1[%9, %c0_2] : memref<976x128xf32, #tpu.memory_space<vmem>>, vector<288x128xf32>
    %c0_3 = arith.constant 0 : index
    %c0_4 = arith.constant 0 : index
    %11 = vector.load %arg2[%c0_3, %c0_4] : memref<3x128xf32, #tpu.memory_space<vmem>>, vector<1x128xf32>
    %12 = vector.broadcast %11 : vector<1x128xf32> to vector<288x128xf32>
    %13 = arith.mulf %5, %12 : vector<288x128xf32>
    %c1 = arith.constant 1 : index
    %c0_5 = arith.constant 0 : index
    %14 = vector.load %arg2[%c1, %c0_5] : memref<3x128xf32, #tpu.memory_space<vmem>>, vector<1x128xf32>
    %15 = vector.broadcast %14 : vector<1x128xf32> to vector<288x128xf32>
    %16 = arith.mulf %7, %15 : vector<288x128xf32>
    %17 = arith.addf %13, %16 : vector<288x128xf32>
    %c2 = arith.constant 2 : index
    %c0_6 = arith.constant 0 : index
    %18 = vector.load %arg2[%c2, %c0_6] : memref<3x128xf32, #tpu.memory_space<vmem>>, vector<1x128xf32>
    %19 = vector.broadcast %18 : vector<1x128xf32> to vector<288x128xf32>
    %20 = arith.mulf %10, %19 : vector<288x128xf32>
    %21 = arith.addf %17, %20 : vector<288x128xf32>
    %22 = tpu.iota {dimensions = array<i32: 0>} : vector<288x1xi32>
    %c32_i32 = arith.constant 32 : i32
    %c0_i32 = arith.constant 0 : i32
    %23 = arith.cmpi eq, %c32_i32, %c0_i32 : i32
    %c1_i32_7 = arith.constant 1 : i32
    %24 = arith.select %23, %c1_i32_7, %c32_i32 : i32
    %25 = vector.broadcast %24 : i32 to vector<288x1xi32>
    %26 = arith.remsi %22, %25 : vector<288x1xi32>
    %c0_i32_8 = arith.constant 0 : i32
    %27 = vector.broadcast %c0_i32_8 : i32 to vector<288x1xi32>
    %28 = arith.cmpi ne, %26, %27 : vector<288x1xi32>
    %c0_i32_9 = arith.constant 0 : i32
    %29 = vector.broadcast %c0_i32_9 : i32 to vector<288x1xi32>
    %30 = arith.cmpi slt, %26, %29 : vector<288x1xi32>
    %c0_i32_10 = arith.constant 0 : i32
    %31 = arith.cmpi slt, %24, %c0_i32_10 : i32
    %32 = vector.broadcast %31 : i1 to vector<288x1xi1>
    %33 = vector.broadcast %32 : vector<288x1xi1> to vector<288x1xi1>
    %34 = arith.xori %30, %33 : vector<288x1xi1>
    %35 = arith.andi %34, %28 : vector<288x1xi1>
    %36 = vector.broadcast %24 : i32 to vector<288x1xi32>
    %37 = arith.addi %26, %36 : vector<288x1xi32>
    %38 = arith.select %35, %37, %26 : vector<288x1xi1>, vector<288x1xi32>
    %c1_i32_11 = arith.constant 1 : i32
    %39 = vector.broadcast %c1_i32_11 : i32 to vector<288x1xi32>
    %40 = arith.cmpi sge, %38, %39 : vector<288x1xi32>
    %c28_i32 = arith.constant 28 : i32
    %41 = vector.broadcast %c28_i32 : i32 to vector<288x1xi32>
    %42 = arith.cmpi sle, %38, %41 : vector<288x1xi32>
    %43 = arith.andi %40, %42 : vector<288x1xi1>
    %cst = arith.constant 0.000000e+00 : f32
    %44 = vector.shape_cast %43 : vector<288x1xi1> to vector<288x1xi1>
    %45 = vector.broadcast %44 : vector<288x1xi1> to vector<288x128xi1>
    %46 = vector.broadcast %cst : f32 to vector<288x128xf32>
    %47 = arith.select %45, %21, %46 : vector<288x128xi1>, vector<288x128xf32>
    %cst_12 = arith.constant 0.000000e+00 : f32
    %48 = vector.broadcast %cst_12 : f32 to vector<8x128xf32>
    %c0_13 = arith.constant 0 : index
    %c0_14 = arith.constant 0 : index
    %49 = vector.load %arg6[%c0_13, %c0_14] : memref<304x128xf32, #tpu.memory_space<vmem>>, vector<8x128xf32>
    tpu.vector_store %arg6[%c0_13, %c0_14], %48 {strides = array<i32>} : memref<304x128xf32, #tpu.memory_space<vmem>>, vector<8x128xf32>,
    %cst_15 = arith.constant 0.000000e+00 : f32
    %50 = vector.broadcast %cst_15 : f32 to vector<8x128xf32>
    %c296 = arith.constant 296 : index
    %c0_16 = arith.constant 0 : index
    %51 = vector.load %arg6[%c296, %c0_16] : memref<304x128xf32, #tpu.memory_space<vmem>>, vector<8x128xf32>
    tpu.vector_store %arg6[%c296, %c0_16], %50 {strides = array<i32>} : memref<304x128xf32, #tpu.memory_space<vmem>>, vector<8x128xf32>,
    %c8 = arith.constant 8 : index
    %c0_17 = arith.constant 0 : index
    %52 = vector.load %arg6[%c8, %c0_17] : memref<304x128xf32, #tpu.memory_space<vmem>>, vector<288x128xf32>
    tpu.vector_store %arg6[%c8, %c0_17], %47 {strides = array<i32>} : memref<304x128xf32, #tpu.memory_space<vmem>>, vector<288x128xf32>,
    %cst_18 = arith.constant 0.000000e+00 : f32
    %53 = vector.broadcast %cst_18 : f32 to vector<224x128xf32>
    %c7 = arith.constant 7 : index
    %c0_19 = arith.constant 0 : index
    %54 = vector.load %arg6[%c7, %c0_19] : memref<304x128xf32, #tpu.memory_space<vmem>>, vector<224x128xf32>
    %c9 = arith.constant 9 : index
    %c0_20 = arith.constant 0 : index
    %55 = vector.load %arg6[%c9, %c0_20] : memref<304x128xf32, #tpu.memory_space<vmem>>, vector<224x128xf32>
    %56 = tpu.concatenate %54, %55 in 1 : vector<224x128xf32>, vector<224x128xf32> -> vector<224x256xf32>
    %57 = arith.truncf %56 : vector<224x256xf32> to vector<224x256xbf16>
    %c0_21 = arith.constant 0 : index
    %c0_22 = arith.constant 0 : index
    %c0_23 = arith.constant 0 : index
    %58 = vector.load %arg3[%c0_21, %c0_22, %c0_23] : memref<4x256x128xbf16, #tpu.memory_space<vmem>>, vector<1x256x128xbf16>
    %59 = vector.shape_cast %58 : vector<1x256x128xbf16> to vector<256x128xbf16>
    %cst_24 = arith.constant dense<0.000000e+00> : vector<224x128xf32>
    %60 = tpu.matmul %57, %59, %cst_24 {dimension_numbers = #tpu.dot_dimension_numbers<[1], [0], [0], [1], [0, 0, 1, 1], [], []>} : vector<224x256xbf16>, vector<256x128xbf16>, vector<224x128xf32> -> vector<224x128xf32>
    %61 = arith.addf %53, %60 : vector<224x128xf32>
    %c39 = arith.constant 39 : index
    %c0_25 = arith.constant 0 : index
    %62 = vector.load %arg6[%c39, %c0_25] : memref<304x128xf32, #tpu.memory_space<vmem>>, vector<224x128xf32>
    %c41 = arith.constant 41 : index
    %c0_26 = arith.constant 0 : index
    %63 = vector.load %arg6[%c41, %c0_26] : memref<304x128xf32, #tpu.memory_space<vmem>>, vector<224x128xf32>
    %64 = tpu.concatenate %62, %63 in 1 : vector<224x128xf32>, vector<224x128xf32> -> vector<224x256xf32>
    %65 = arith.truncf %64 : vector<224x256xf32> to vector<224x256xbf16>
    %c1_27 = arith.constant 1 : index
    %c0_28 = arith.constant 0 : index
    %c0_29 = arith.constant 0 : index
    %66 = vector.load %arg3[%c1_27, %c0_28, %c0_29] : memref<4x256x128xbf16, #tpu.memory_space<vmem>>, vector<1x256x128xbf16>
    %67 = vector.shape_cast %66 : vector<1x256x128xbf16> to vector<256x128xbf16>
    %cst_30 = arith.constant dense<0.000000e+00> : vector<224x128xf32>
    %68 = tpu.matmul %65, %67, %cst_30 {dimension_numbers = #tpu.dot_dimension_numbers<[1], [0], [0], [1], [0, 0, 1, 1], [], []>} : vector<224x256xbf16>, vector<256x128xbf16>, vector<224x128xf32> -> vector<224x128xf32>
    %69 = arith.addf %61, %68 : vector<224x128xf32>
    %c71 = arith.constant 71 : index
    %c0_31 = arith.constant 0 : index
    %70 = vector.load %arg6[%c71, %c0_31] : memref<304x128xf32, #tpu.memory_space<vmem>>, vector<224x128xf32>
    %c73 = arith.constant 73 : index
    %c0_32 = arith.constant 0 : index
    %71 = vector.load %arg6[%c73, %c0_32] : memref<304x128xf32, #tpu.memory_space<vmem>>, vector<224x128xf32>
    %72 = tpu.concatenate %70, %71 in 1 : vector<224x128xf32>, vector<224x128xf32> -> vector<224x256xf32>
    %73 = arith.truncf %72 : vector<224x256xf32> to vector<224x256xbf16>
    %c2_33 = arith.constant 2 : index
    %c0_34 = arith.constant 0 : index
    %c0_35 = arith.constant 0 : index
    %74 = vector.load %arg3[%c2_33, %c0_34, %c0_35] : memref<4x256x128xbf16, #tpu.memory_space<vmem>>, vector<1x256x128xbf16>
    %75 = vector.shape_cast %74 : vector<1x256x128xbf16> to vector<256x128xbf16>
    %cst_36 = arith.constant dense<0.000000e+00> : vector<224x128xf32>
    %76 = tpu.matmul %73, %75, %cst_36 {dimension_numbers = #tpu.dot_dimension_numbers<[1], [0], [0], [1], [0, 0, 1, 1], [], []>} : vector<224x256xbf16>, vector<256x128xbf16>, vector<224x128xf32> -> vector<224x128xf32>
    %77 = arith.addf %69, %76 : vector<224x128xf32>
    %c8_37 = arith.constant 8 : index
    %c0_38 = arith.constant 0 : index
    %78 = vector.load %arg6[%c8_37, %c0_38] : memref<304x128xf32, #tpu.memory_space<vmem>>, vector<224x128xf32>
    %c72 = arith.constant 72 : index
    %c0_39 = arith.constant 0 : index
    %79 = vector.load %arg6[%c72, %c0_39] : memref<304x128xf32, #tpu.memory_space<vmem>>, vector<224x128xf32>
    %80 = tpu.concatenate %78, %79 in 1 : vector<224x128xf32>, vector<224x128xf32> -> vector<224x256xf32>
    %81 = arith.truncf %80 : vector<224x256xf32> to vector<224x256xbf16>
    %c3 = arith.constant 3 : index
    %c0_40 = arith.constant 0 : index
    %c0_41 = arith.constant 0 : index
    %82 = vector.load %arg3[%c3, %c0_40, %c0_41] : memref<4x256x128xbf16, #tpu.memory_space<vmem>>, vector<1x256x128xbf16>
    %83 = vector.shape_cast %82 : vector<1x256x128xbf16> to vector<256x128xbf16>
    %cst_42 = arith.constant dense<0.000000e+00> : vector<224x128xf32>
    %84 = tpu.matmul %81, %83, %cst_42 {dimension_numbers = #tpu.dot_dimension_numbers<[1], [0], [0], [1], [0, 0, 1, 1], [], []>} : vector<224x256xbf16>, vector<256x128xbf16>, vector<224x128xf32> -> vector<224x128xf32>
    %85 = arith.addf %77, %84 : vector<224x128xf32>
    %c40 = arith.constant 40 : index
    %c0_43 = arith.constant 0 : index
    %86 = vector.load %arg6[%c40, %c0_43] : memref<304x128xf32, #tpu.memory_space<vmem>>, vector<224x128xf32>
    %87 = arith.truncf %86 : vector<224x128xf32> to vector<224x128xbf16>
    %c0_44 = arith.constant 0 : index
    %c0_45 = arith.constant 0 : index
    %88 = vector.load %arg4[%c0_44, %c0_45] : memref<128x128xbf16, #tpu.memory_space<vmem>>, vector<128x128xbf16>
    %cst_46 = arith.constant dense<0.000000e+00> : vector<224x128xf32>
    %89 = tpu.matmul %87, %88, %cst_46 {dimension_numbers = #tpu.dot_dimension_numbers<[1], [0], [0], [1], [0, 0, 1, 1], [], []>} : vector<224x128xbf16>, vector<128x128xbf16>, vector<224x128xf32> -> vector<224x128xf32>
    %90 = arith.addf %85, %89 : vector<224x128xf32>
    %c0_47 = arith.constant 0 : index
    %c0_48 = arith.constant 0 : index
    %91 = vector.load %arg5[%c0_47, %c0_48] : memref<224x128xf32, #tpu.memory_space<vmem>>, vector<224x128xf32>
    tpu.vector_store %arg5[%c0_47, %c0_48], %90 {strides = array<i32>} : memref<224x128xf32, #tpu.memory_space<vmem>>, vector<224x128xf32>,
    return
  }
  func.func @transform_0(%arg0: i32) -> (i32, i32) {
    %c0_i32 = arith.constant 0 : i32
    %c0_i32_0 = arith.constant 0 : i32
    %c0_i32_1 = arith.constant 0 : i32
    return %c0_i32, %c0_i32_0 : i32, i32
  }
  func.func @transform_1(%arg0: i32) -> (i32, i32) {
    %c0_i32 = arith.constant 0 : i32
    %c0_i32_0 = arith.constant 0 : i32
    %c0_i32_1 = arith.constant 0 : i32
    return %c0_i32, %c0_i32_0 : i32, i32
  }
  func.func @transform_2(%arg0: i32) -> (i32, i32, i32) {
    %c0_i32 = arith.constant 0 : i32
    %c0_i32_0 = arith.constant 0 : i32
    %c0_i32_1 = arith.constant 0 : i32
    %c0_i32_2 = arith.constant 0 : i32
    return %c0_i32, %c0_i32_0, %c0_i32_1 : i32, i32, i32
  }
  func.func @transform_3(%arg0: i32) -> (i32, i32) {
    %c0_i32 = arith.constant 0 : i32
    %c0_i32_0 = arith.constant 0 : i32
    %c0_i32_1 = arith.constant 0 : i32
    return %c0_i32, %c0_i32_0 : i32, i32
  }
  func.func @transform_4(%arg0: i32) -> (i32, i32) {
    %c0_i32 = arith.constant 0 : i32
    %c0_i32_0 = arith.constant 0 : i32
    return %arg0, %c0_i32 : i32, i32
  }
}

</mosaic_0001>

<bundles_post_ra>
// kernel: kernel_manual_1_forward.1
= control target key start
LH: loop header
LB: loop body
LE: loop exit
PB: predicated region body
PF: predicated region fallthrough
CT: control target
= control target key end

     0   :  { %s3887_s15 = smov 0   ;;  %s5121_s0 = inlined_call_operand.vmem [shape: f32[976,128], index: 0, kind: input, shape index: {}]   ;;  %s5122_s1 = inlined_call_operand.vmem [shape: f32[3,128], index: 1, kind: input, shape index: {}]   ;;  %s5123_s2 = inlined_call_operand.vmem [shape: bf16[4,256,128], index: 2, kind: input, shape index: {}]   ;;  %s5124_s3 = inlined_call_operand.vmem [shape: bf16[128,128], index: 3, kind: input, shape index: {}]   ;;  %s5125_s4 = inlined_call_operand.vmem [shape: f32[896,128], index: 4, kind: output, shape index: {}]  }
   0x1 LB: > { %s2956_s16 = sadd.s32 4294967295, %s3858_s15   ;;  %p2959_p0 = scmp.ge.s32.totalorder %s3858_s15, 1  ;;  %s3858_s15 = sphi %s3887_s15, %s14_s15  }
   0x2   : > { %p152_p1 = scmp.lt.s32.totalorder %s3858_s15, 5 }
   0x4   : > { %p153_p2 = pnand %p2959_p0, %p152_p1 }
   0x6   : > { %156 = sbr.rel (%p153_p2) target bundleno = 522 (0x20a), region = 36 }
   0xd   : > { %v3698_v0 = vld [vmem:[%s5123_s2 + $0xc0] sm:$0xff]   ;;  %v3860_v3 = vmov 0.0   ;;  %v3702_v5 = vld [vmem:[%s5123_s2 + $0xc8] sm:$0xff]   ;;  %v3706_v9 = vld [vmem:[%s5123_s2 + $0xd0] sm:$0xff]   ;;  %v490_v17 = vlaneseq  ;;  %s3954_s5 = smul.u32 224, %s2956_s16 }
   0xe   : > { %v3699_v1 = vld [vmem:[%s5123_s2 + $0x40] sm:$0xff]   ;;  %3207 = vmatprep.subr.bf16.mxu0 %v3698_v0  ;;  %1175 = vst [vmem:[#allocation2] sm:$0xff] %v3860_v3  ;;  %1176 = vst [vmem:[#allocation2 + $0x128] sm:$0xff] %v3860_v3  ;;  %v3703_v6 = vld [vmem:[%s5123_s2 + $0x48] sm:$0xff]   ;;  %s173_s20 = smul.u32 28, %s2956_s16 }
   0xf   : > { %v3700_v2 = vld [vmem:[%s5123_s2 + $0x80] sm:$0xff]   ;;  %3307 = vmatprep.subr.bf16.mxu1 %v3699_v1  ;;  %v3704_v7 = vld [vmem:[%s5123_s2 + $0x88] sm:$0xff]   ;;  %v3707_v10 = vld [vmem:[%s5123_s2 + $0x50] sm:$0xff]   ;;  %v3959_v22 = vshrl.u32 %v490_v17, 7  ;;  %s181_s14 = sadd.s32 8, %s3954_s5 }
  0x10   : > { %v3701_v4 = vld [vmem:[%s5123_s2] sm:$0xff]   ;;  %3208 = vmatpush3.bf16.msra.mxu0 %v3700_v2  ;;  %v3705_v8 = vld [vmem:[%s5123_s2 + $0x8] sm:$0xff]   ;;  %v3708_v11 = vld [vmem:[%s5123_s2 + $0x90] sm:$0xff]   ;;  %s2961_s23 = sadd.s32 4294967295, %s181_s14  ;;  %s4012_s14 = scalar_lea.vmem %s5121_s0, %s3954_s5 }
  0x11   : > { %3308 = vmatpush3.bf16.msra.mxu1 %v3701_v4  ;;  %3209 = vmatprep.subr.bf16.mxu0 %v3702_v5  ;;  %v3709_v12 = vld [vmem:[%s5123_s2 + $0x10] sm:$0xff]   ;;  %v3710_v13 = vld [vmem:[%s5123_s2 + $0xd8] sm:$0xff]   ;;  %v3714_v18 = vld [vmem:[%s5123_s2 + $0xe0] sm:$0xff]   ;;  %v495_v27 = vadd.s32 32, %v3959_v22  ;;  %v531_v31 = vand.u32 31, %v3959_v22  ;;  %v3992_v35 = vadd.s32 24, %v3959_v22  ;;  %s4000_s9 = scalar_lea.vmem %s5121_s0, %s2961_s23 }
  0x12   : > { %3309 = vmatprep.subr.bf16.mxu1 %v3703_v6  ;;  %v3711_v14 = vld [vmem:[%s5123_s2 + $0x58] sm:$0xff]   ;;  %v3715_v19 = vld [vmem:[%s5123_s2 + $0x60] sm:$0xff]   ;;  %v3718_v23 = vld [vmem:[%s5123_s2 + $0xe8] sm:$0xff]   ;;  %v4003_v37 = vadd.s32 56, %v3959_v22  ;;  %v4015_v39 = vadd.s32 64, %v3959_v22  ;;  %p174_p3 = scmp.lt.s32.totalorder %s173_s20, 111 }
  0x13   : > { %v3712_v15 = vld [vmem:[%s5123_s2 + $0x98] sm:$0xff]   ;;  %v3716_v20 = vld [vmem:[%s5123_s2 + $0xa0] sm:$0xff]   ;;  %v3719_v24 = vld [vmem:[%s5123_s2 + $0x68] sm:$0xff]   ;;  %v559_v33 = vand.u32 31, %v495_v27  ;;  %vm4033_vm1 = vcmp.ge.s32.totalorder %v531_v31, 1  ;;  %v552_v52 = vand.u32 31, %v3992_v35 }
  0x14   : > { %3210 = vmatpush3.bf16.msra.mxu0 %v3704_v7  ;;  %v3713_v16 = vld [vmem:[%s5123_s2 + $0x18] sm:$0xff]   ;;  %v3717_v21 = vld [vmem:[%s5123_s2 + $0x20] sm:$0xff]   ;;  %v3720_v25 = vld [vmem:[%s5123_s2 + $0xa8] sm:$0xff]   ;;  %v580_v53 = vand.u32 31, %v4003_v37  ;;  %v587_v54 = vand.u32 31, %v4015_v39  ;;  %s5238_s20 = smov (!%p174_p3, %s173_s20), 111 }
  0x15   : > { %3310 = vmatpush3.bf16.msra.mxu1 %v3705_v8  ;;  %3211 = vmatprep.subr.bf16.mxu0 %v3706_v9  ;;  %v3721_v26 = vld [vmem:[%s5123_s2 + $0x28] sm:$0xff]   ;;  %v3722_v28 = vld [vmem:[%s5123_s2 + $0xf0] sm:$0xff]   ;;  %v3726_v34 = vld [vmem:[%s5123_s2 + $0xf8] sm:$0xff]   ;;  %vm4026_vm0 = vcmp.ge.s32.totalorder %v559_v33, 1  ;;  %vm4110_vm2 = vcmp.le.s32.totalorder %v552_v52, 28  ;;  %s2960_s16 = sshll.u32 %s5238_s20, 3 }
  0x16   : > { %3311 = vmatprep.subr.bf16.mxu1 %v3707_v10  ;;  %v3723_v29 = vld [vmem:[%s5123_s2 + $0x70] sm:$0xff]   ;;  %v3727_v36 = vld [vmem:[%s5123_s2 + $0x78] sm:$0xff]   ;;  %v188_v41 = vld [vmem:[%s4000_s9 + $0x20] sm:$0xff]  ;;  %vm4118_vm3 = vcmp.le.s32.totalorder %v580_v53, 28  ;;  %vm4124_vm4 = vcmp.ge.s32.totalorder %v587_v54, 1  ;;  %s5063_s23 = scalar_lea.vmem %s5125_s4, %s2960_s16 }
  0x17   : > { %v3724_v30 = vld [vmem:[%s5123_s2 + $0xb0] sm:$0xff]   ;;  %v3728_v38 = vld [vmem:[%s5123_s2 + $0xb8] sm:$0xff]   ;;  %v189_v42 = vld [vmem:[%s4000_s9 + $0x28] sm:$0xff] }
  0x18   : > { %3212 = vmatpush3.bf16.msra.mxu0 %v3708_v11  ;;  %v3725_v32 = vld [vmem:[%s5123_s2 + $0x30] sm:$0xff]   ;;  %v3729_v40 = vld [vmem:[%s5123_s2 + $0x38] sm:$0xff]   ;;  %v2966_v44 = vld [vmem:[%s4012_s14 + $0x28] sm:$0xff] }
  0x19   : > { %3312 = vmatpush3.bf16.msra.mxu1 %v3709_v12  ;;  %3213 = vmatprep.subr.bf16.mxu0 %v3710_v13  ;;  %v190_v43 = vld [vmem:[%s4000_s9 + $0x30] sm:$0xff]  ;;  %v2968_v46 = vld [vmem:[%s4012_s14 + $0x38] sm:$0xff]  ;;  %v4043_v55 = vld [vmem:[%s5122_s1] ss:$0 sm:$0xff] }
  0x1a   : > { %3313 = vmatprep.subr.bf16.mxu1 %v3711_v14  ;;  %v2967_v45 = vld [vmem:[%s4012_s14 + $0x30] sm:$0xff]  ;;  %v3004_v50 = vld [vmem:[%s4012_s14 + $0x39] sm:$0xff]  ;;  %v4048_v56 = vld [vmem:[%s5122_s1 + $0x1] ss:$0 sm:$0xff]  ;;  %v304_v58 = vmul.f32 %v4043_v55, %v188_v41  ;;  %v305_v59 = vmul.f32 %v4043_v55, %v189_v42  ;;  %v306_v60 = vmul.f32 %v4043_v55, %v190_v43 }
  0x1b   : > { %v3002_v48 = vld [vmem:[%s4012_s14 + $0x29] sm:$0xff]  ;;  %v3003_v49 = vld [vmem:[%s4012_s14 + $0x31] sm:$0xff]  ;;  %v4053_v57 = vld [vmem:[%s5122_s1 + $0x2] ss:$0 sm:$0xff]  ;;  %v345_v61 = vmul.f32 %v4048_v56, %v2966_v44  ;;  %v346_v1 = vmul.f32 %v4048_v56, %v2967_v45  ;;  %v347_v2 = vmul.f32 %v4048_v56, %v2968_v46 }
  0x1c   : > { %3214 = vmatpush3.bf16.msra.mxu0 %v3712_v15  ;;  %v184_v62 = vld [vmem:[%s4000_s9] sm:$0xff]  ;;  %v185_v63 = vld [vmem:[%s4000_s9 + $0x8] sm:$0xff]  ;;  %v186_v0 = vld [vmem:[%s4000_s9 + $0x10] sm:$0xff]  ;;  %v422_v3 = vmul.f32 %v4053_v57, %v3002_v48  ;;  %v423_v4 = vmul.f32 %v4053_v57, %v3003_v49  ;;  %v424_v9 = vmul.f32 %v4053_v57, %v3004_v50 }
  0x1d   : > { %3314 = vmatpush3.bf16.msra.mxu1 %v3713_v16  ;;  %3215 = vmatprep.subr.bf16.mxu0 %v3714_v18  ;;  %v2962_v5 = vld [vmem:[%s4012_s14 + $0x8] sm:$0xff]  ;;  %v2963_v6 = vld [vmem:[%s4012_s14 + $0x10] sm:$0xff]  ;;  %v2964_v7 = vld [vmem:[%s4012_s14 + $0x18] sm:$0xff]  ;;  %v381_v8 = vadd.f32 %v345_v61, %v304_v58  ;;  %v300_v13 = vmul.f32 %v4043_v55, %v184_v62  ;;  %v301_v14 = vmul.f32 %v4043_v55, %v185_v63 }
  0x1e   : > { %3315 = vmatprep.subr.bf16.mxu1 %v3715_v19  ;;  %v2998_v10 = vld [vmem:[%s4012_s14 + $0x9] sm:$0xff]  ;;  %v2999_v11 = vld [vmem:[%s4012_s14 + $0x11] sm:$0xff]  ;;  %v3000_v12 = vld [vmem:[%s4012_s14 + $0x19] sm:$0xff]  ;;  %v382_v15 = vadd.f32 %v346_v1, %v305_v59  ;;  %v383_v16 = vadd.f32 %v347_v2, %v306_v60  ;;  %v302_v17 = vmul.f32 %v4043_v55, %v186_v0  ;;  %v341_v18 = vmul.f32 %v4048_v56, %v2962_v5 }
  0x1f   : > { %v187_v19 = vld [vmem:[%s4000_s9 + $0x18] sm:$0xff]  ;;  %v3730_v27 = vld [vmem:[%s5123_s2 + $0x140] sm:$0xff]   ;;  %v419_v31 = vmul.f32 %v4053_v57, %v2999_v11  ;;  %v2970_v46 = vld [vmem:[%s4012_s14 + $0x48] sm:$0xff] }
  0x20   : > { %3216 = vmatpush3.bf16.msra.mxu0 %v3716_v20  ;;  %v2965_v20 = vld [vmem:[%s4012_s14 + $0x20] sm:$0xff]  ;;  %v303_v43 = vmul.f32 %v4043_v55, %v187_v19  ;;  %v3006_v48 = vld [vmem:[%s4012_s14 + $0x49] sm:$0xff]  ;;  %v349_v0 = vmul.f32 %v4048_v56, %v2970_v46 }
  0x21   : > { %3316 = vmatpush3.bf16.msra.mxu1 %v3717_v21  ;;  %3217 = vmatprep.subr.bf16.mxu0 %v3718_v23  ;;  %v3001_v21 = vld [vmem:[%s4012_s14 + $0x21] sm:$0xff]  ;;  %v458_v23 = vadd.f32 %v422_v3, %v381_v8  ;;  %v344_v44 = vmul.f32 %v4048_v56, %v2965_v20  ;;  %v426_v2 = vmul.f32 %v4053_v57, %v3006_v48  ;;  %v2971_v8 = vld [vmem:[%s4012_s14 + $0x50] sm:$0xff]  ;;  %v3008_v37 = vld [vmem:[%s4012_s14 + $0x59] sm:$0xff] }
  0x22   : > { %3317 = vmatprep.subr.bf16.mxu1 %v3719_v24  ;;  %v342_v24 = vmul.f32 %v4048_v56, %v2963_v6  ;;  %v2969_v41 = vld [vmem:[%s4012_s14 + $0x40] sm:$0xff]  ;;  %v421_v45 = vmul.f32 %v4053_v57, %v3001_v21  ;;  %v193_v52 = vld [vmem:[%s4000_s9 + $0x48] sm:$0xff]  ;;  %v428_v20 = vmul.f32 %v4053_v57, %v3008_v37  ;;  %v503_v21 = vadd.s32 96, %v3959_v22 }
  0x23   : > { %v3005_v47 = vld [vmem:[%s4012_s14 + $0x41] sm:$0xff]  ;;  %v380_v62 = vadd.f32 %v344_v44, %v303_v43  ;;  %v348_v63 = vmul.f32 %v4048_v56, %v2969_v41  ;;  %v309_v53 = vmul.f32 %v4043_v55, %v193_v52  ;;  %v3764_v52 = vld [vmem:[%s5124_s3 + $0x10] sm:$0xff]  }
  0x24   : > { %3218 = vmatpush3.bf16.msra.mxu0 %v3720_v25  ;;  %v343_v25 = vmul.f32 %v4048_v56, %v2964_v7  ;;  %v378_v33 = vadd.f32 %v342_v24, %v301_v14  ;;  %v3732_v60 = vld [vmem:[%s5123_s2 + $0x1c0] sm:$0xff]   ;;  %v425_v51 = vmul.f32 %v4053_v57, %v3005_v47  ;;  %v194_v7 = vld [vmem:[%s4000_s9 + $0x50] sm:$0xff]  ;;  %v2974_v48 = vld [vmem:[%s4012_s14 + $0x68] sm:$0xff] }
  0x25   : > { %3318 = vmatpush3.bf16.msra.mxu1 %v3721_v26  ;;  %3219 = vmatprep.subr.bf16.mxu0 %v3722_v28  ;;  %v418_v26 = vmul.f32 %v4053_v57, %v2998_v10  ;;  %v459_v28 = vadd.f32 %v423_v4, %v382_v15  ;;  %v457_v4 = vadd.f32 %v421_v45, %v380_v62  ;;  %v3007_v10 = vld [vmem:[%s4012_s14 + $0x51] sm:$0xff]  ;;  %v2973_v43 = vld [vmem:[%s4012_s14 + $0x60] sm:$0xff]  ;;  %v3737_v37 = vld [vmem:[%s5123_s2 + $0x188] sm:$0xff]  }
  0x26   : > { %3319 = vmatprep.subr.bf16.mxu1 %v3723_v29  ;;  %v460_v29 = vadd.f32 %v424_v9, %v383_v16  ;;  %v455_v49 = vadd.f32 %v419_v31, %v378_v33  ;;  %v2972_v9 = vld [vmem:[%s4012_s14 + $0x58] sm:$0xff]  ;;  %v310_v11 = vmul.f32 %v4043_v55, %v194_v7  ;;  %v427_v19 = vmul.f32 %v4053_v57, %v3007_v10  ;;  %v3731_v47 = vld [vmem:[%s5123_s2 + $0x100] sm:$0xff]  }
  0x27   : > { %1182 = vst [vmem:[#allocation2 + $0x30] sm:$0xff] %v459_v28  ;;  %v1142_v39 = vsel %vm4110_vm2, %v457_v4, 0.0  ;;  %v351_v15 = vmul.f32 %v4048_v56, %v2972_v9  ;;  %v353_v62 = vmul.f32 %v4048_v56, %v2974_v48  ;;  %v200_v48 = vld [vmem:[%s4000_s9 + $0x80] sm:$0xff]  ;;  %vm3861_vm2 = vmmov 1  }
  0x28   : > { %3220 = vmatpush3.bf16.msra.mxu0 %v3724_v30  ;;  %v377_v30 = vadd.f32 %v341_v18, %v300_v13  ;;  %1183 = vst [vmem:[#allocation2 + $0x38] sm:$0xff] %v460_v29  ;;  %1178 = vst [vmem:[#allocation2 + $0x10] sm:$0xff] %v455_v49  ;;  %v502_v13 = vadd.s32 88, %v3959_v22  ;;  %v195_v29 = vld [vmem:[%s4000_s9 + $0x58] sm:$0xff]  ;;  %v3009_v49 = vld [vmem:[%s4012_s14 + $0x61] sm:$0xff] }
  0x29   : > { %3320 = vmatpush3.bf16.msra.mxu1 %v3725_v32  ;;  %3221 = vmatprep.subr.bf16.mxu0 %v3726_v34  ;;  %v1143_v32 = vsel %vm4026_vm0, %v458_v23, 0.0  ;;  %v379_v34 = vadd.f32 %v343_v25, %v302_v17  ;;  %1180 = vst [vmem:[#allocation2 + $0x20] sm:$0xff] %v1142_v39  ;;  %v3766_v10 = vld [vmem:[%s5124_s3 + $0x20] sm:$0xff]  }
  0x2a   : > { %3321 = vmatprep.subr.bf16.mxu1 %v3727_v36  ;;  %v420_v36 = vmul.f32 %v4053_v57, %v3000_v12  ;;  %1181 = vst [vmem:[#allocation2 + $0x28] sm:$0xff] %v1143_v32  ;;  %v454_v42 = vadd.f32 %v418_v26, %v377_v30  ;;  %v350_v12 = vmul.f32 %v4048_v56, %v2971_v8  ;;  %v196_v30 = vld [vmem:[%s4000_s9 + $0x60] sm:$0xff]  ;;  %v608_v45 = vand.u32 31, %v502_v13 }
  0x2b   : > { %v387_v26 = vadd.f32 %v351_v15, %v310_v11  ;;  %v312_v44 = vmul.f32 %v4043_v55, %v196_v30  ;;  %v3011_v30 = vld [vmem:[%s4012_s14 + $0x71] sm:$0xff] }
  0x2c   : > { %3222 = vmatpush3.bf16.msra.mxu0 %v3728_v38  ;;  %v191_v38 = vld [vmem:[%s4000_s9 + $0x38] sm:$0xff]  ;;  %v456_v50 = vadd.f32 %v420_v36, %v379_v34  ;;  %v1139_v61 = vsel %vm4033_vm1, %v454_v42, 0.0  ;;  %v386_v18 = vadd.f32 %v350_v12, %v309_v53  ;;  %v3736_v42 = vld [vmem:[%s5123_s2 + $0x1c8] sm:$0xff]   ;;  %vm4180_vm5 = vcmp.le.s32.totalorder %v608_v45, 28 }
  0x2d   : > { %3322 = vmatpush3.bf16.msra.mxu1 %v3729_v40  ;;  %3407 = vmatprep.subr.bf16.mxu0 %v3730_v27  ;;  %v192_v40 = vld [vmem:[%s4000_s9 + $0x40] sm:$0xff]  ;;  %v307_v58 = vmul.f32 %v4043_v55, %v191_v38  ;;  %1177 = vst [vmem:[#allocation2 + $0x8] sm:$0xff] %v1139_v61  ;;  %v4156_v36 = vadd.f32 %v428_v20, %v387_v26  ;;  %v3734_v61 = vld [vmem:[%s5123_s2 + $0x148] sm:$0xff]   ;;  %v3739_v20 = vld [vmem:[%s5123_s2 + $0x110] sm:$0xff]   ;;  %v506_v26 = vadd.s32 120, %v3959_v22 }
  0x2e   : > { %v308_v59 = vmul.f32 %v4043_v55, %v192_v40  ;;  %1179 = vst [vmem:[#allocation2 + $0x18] sm:$0xff] %v456_v50  ;;  %3507 = vmatprep.subr.bf16.mxu1 %v3732_v60  ;;  %v3733_v27 = vld [vmem:[%s5123_s2 + $0x180] sm:$0xff]   ;;  %v463_v28 = vadd.f32 %v427_v19, %v386_v18  ;;  %v311_v38 = vmul.f32 %v4043_v55, %v195_v29  ;;  %v3010_v50 = vld [vmem:[%s4012_s14 + $0x69] sm:$0xff]  ;;  %v2976_v29 = vld [vmem:[%s4012_s14 + $0x78] sm:$0xff] }
  0x2f   : > { %v384_v5 = vadd.f32 %v348_v63, %v307_v58  ;;  %v1246_v17 = vld [vmem:[#allocation2 + $0x31] sm:$0xff]  ;;  %1187 = vst [vmem:[#allocation2 + $0x58] sm:$0xff] %v4156_v36  ;;  %v352_v58 = vmul.f32 %v4048_v56, %v2973_v43  ;;  %v429_v63 = vmul.f32 %v4053_v57, %v3009_v49  ;;  %v389_v35 = vadd.f32 %v353_v62, %v312_v44  ;;  %v2977_v49 = vld [vmem:[%s4012_s14 + $0x80] sm:$0xff] }
  0x30   : > { %v385_v6 = vadd.f32 %v349_v0, %v308_v59  ;;  %1186 = vst [vmem:[#allocation2 + $0x50] sm:$0xff] %v463_v28  ;;  %v615_v59 = vand.u32 31, %v503_v21  ;;  %v430_v0 = vmul.f32 %v4053_v57, %v3010_v50  ;;  %v1219_v11 = vld [vmem:[#allocation2 + $0x37] sm:$0xff]  ;;  %v197_v21 = vld [vmem:[%s4000_s9 + $0x68] sm:$0xff]  ;;  %v636_v50 = vand.u32 31, %v506_v26 }
  0x31   : > { %v461_v54 = vadd.f32 %v425_v51, %v384_v5  ;;  %v1245_v16 = vld [vmem:[#allocation2 + $0x29] sm:$0xff]  ;;  %v388_v3 = vadd.f32 %v352_v58, %v311_v38  ;;  %v355_v38 = vmul.f32 %v4048_v56, %v2976_v29  ;;  %v316_v62 = vmul.f32 %v4043_v55, %v200_v48 }
  0x32   : > { %v462_v14 = vadd.f32 %v426_v2, %v385_v6  ;;  %v4144_v23 = vpack.c.bf16 %v1246_v17, %v1245_v16  ;;  %v1218_v33 = vld [vmem:[#allocation2 + $0x2f] sm:$0xff]  ;;  %v1217_v1 = vld [vmem:[#allocation2 + $0x27] sm:$0xff]  ;;  %vm4186_vm6 = vcmp.ge.s32.totalorder %v615_v59, 1  ;;  %v4196_v13 = vadd.f32 %v430_v0, %v389_v35 }
  0x33   : > { %v1146_v24 = vsel %vm4118_vm3, %v461_v54, 0.0  ;;  %v1244_v2 = vld [vmem:[#allocation2 + $0x21] sm:$0xff]  ;;  %v4178_v4 = vpack.c.bf16 %v1218_v33, %v1217_v1  ;;  %v4184_v9 = vadd.f32 %v429_v63, %v388_v3  ;;  %v3738_v18 = vld [vmem:[%s5123_s2 + $0x150] sm:$0xff]   ;;  %vm4270_vm8 = vcmp.le.s32.totalorder %v636_v50, 28  ;;  %vm4701_vm3 = vmpackc.low %vm4180_vm5, %vm3861_vm2 }
  0x34   : > { %v1147_v25 = vsel %vm4124_vm4, %v462_v14, 0.0  ;;  %1184 = vst [vmem:[#allocation2 + $0x40] sm:$0xff] %v1146_v24  ;;  %1502 = vmatprep.mubr.bf16.mxu0 %v4144_v23  ;;  %v1241_v31 = vld [vmem:[#allocation2 + $0x9] sm:$0xff]  ;;  %v1151_v17 = vsel %vm4186_vm6, %v4196_v13, 0.0  ;;  %v3013_v59 = vld [vmem:[%s4012_s14 + $0x81] sm:$0xff]  ;;  %v510_v26 = vadd.s32 152, %v3959_v22  ;;  %vm4725_vm4 = vmpackc.low %vm3861_vm2, %vm4186_vm6 }
  0x35   : > { %1185 = vst [vmem:[#allocation2 + $0x48] sm:$0xff] %v1147_v25  ;;  %v1242_v32 = vld [vmem:[#allocation2 + $0x11] sm:$0xff]  ;;  %v1213_v34 = vld [vmem:[#allocation2 + $0x7] sm:$0xff]  ;;  %v1243_v51 = vld [vmem:[#allocation2 + $0x19] sm:$0xff]  ;;  %1503 = vmatmul.mubr.bf16.vlgmr.msra.gmra.mrb[0].mxu0 %v4178_v4  ;;  %v1150_v15 = vsel %vm4180_vm5, %v4184_v9, 0.0 }
  0x36   : > { %v1270_v40 = vpack.c.bf16 %v1242_v32, %v1241_v31  ;;  %v1214_v41 = vld [vmem:[#allocation2 + $0xf] sm:$0xff]  ;;  %v1215_v60 = vld [vmem:[#allocation2 + $0x17] sm:$0xff]  ;;  %v1272_v5 = vpack.c.bf16 %v1244_v2, %v1243_v51  ;;  %v1216_v6 = vld [vmem:[#allocation2 + $0x1f] sm:$0xff]  ;;  %3408 = vmatpush3.bf16.msra.mxu0 %v3731_v47  ;;  %1188 = vst [vmem:[#allocation2 + $0x60] sm:$0xff] %v1150_v15  ;;  %v313_v32 = vmul.f32 %v4043_v55, %v197_v21  ;;  %v664_v50 = vand.u32 31, %v510_v26 }
  0x37   : > { %v1269_v46 = vpack.c.bf16 %v1214_v41, %v1213_v34  ;;  %v1271_v39 = vpack.c.bf16 %v1216_v6, %v1215_v60  ;;  %v3735_v14 = vld [vmem:[%s5123_s2 + $0x108] sm:$0xff]   ;;  %3409 = vmatprep.subr.bf16.mxu0 %v3734_v61  ;;  %v1250_v16 = vld [vmem:[#allocation2 + $0x51] sm:$0xff]  ;;  %1189 = vst [vmem:[#allocation2 + $0x68] sm:$0xff] %v1151_v17  ;;  %v3012_v31 = vld [vmem:[%s4012_s14 + $0x79] sm:$0xff]  ;;  %v356_v2 = vmul.f32 %v4048_v56, %v2977_v49 }
  0x38   : > { %1743 = vmatprep.mubr.bf16.mxu1 %v1270_v40  ;;  %v198_v24 = vld [vmem:[%s4000_s9 + $0x70] sm:$0xff]  ;;  %v431_v40 = vmul.f32 %v4053_v57, %v3011_v30  ;;  %v432_v41 = vmul.f32 %v4053_v57, %v3012_v31  ;;  %v199_v47 = vld [vmem:[%s4000_s9 + $0x78] sm:$0xff]  ;;  %v433_v6 = vmul.f32 %v4053_v57, %v3013_v59  ;;  %v201_v15 = vld [vmem:[%s4000_s9 + $0x88] sm:$0xff]  ;;  %vm4337_vm9 = vcmp.le.s32.totalorder %v664_v50, 28 }
  0x39   : > { %1744 = vmatmul.mubr.bf16.vlgmr.msra.gmra.mrb[0].mxu1 %v1269_v46  ;;  %v2975_v25 = vld [vmem:[%s4012_s14 + $0x70] sm:$0xff]  ;;  %v314_v33 = vmul.f32 %v4043_v55, %v198_v24  ;;  %v315_v61 = vmul.f32 %v4043_v55, %v199_v47  ;;  %v2980_v21 = vld [vmem:[%s4012_s14 + $0x98] sm:$0xff]  ;;  %v2981_v47 = vld [vmem:[%s4012_s14 + $0xa0] sm:$0xff]  ;;  %v515_v50 = vadd.s32 192, %v3959_v22 }
  0x3a   : > { %3508 = vmatpush3.bf16.msra.mxu1 %v3733_v27  ;;  %1751 = vmatprep.mubr.bf16.mxu1 %v1272_v5  ;;  %v507_v27 = vadd.s32 128, %v3959_v22  ;;  %v354_v34 = vmul.f32 %v4048_v56, %v2975_v25  ;;  %v3741_v44 = vld [vmem:[%s5123_s2 + $0x190] sm:$0xff]   ;;  %v317_v25 = vmul.f32 %v4043_v55, %v201_v15  ;;  %v3016_v30 = vld [vmem:[%s4012_s14 + $0x99] sm:$0xff]  ;;  %vm4747_vm5 = vmpackc.low %vm4270_vm8, %vm3861_vm2 }
  0x3b   : > { %v1247_v7 = vld [vmem:[#allocation2 + $0x39] sm:$0xff]  ;;  %3509 = vmatprep.subr.bf16.mxu1 %v3736_v42  ;;  %3410 = vmatpush3.bf16.msra.mxu0 %v3735_v14  ;;  %v3740_v42 = vld [vmem:[%s5123_s2 + $0x1d0] sm:$0xff]   ;;  %v391_v46 = vadd.f32 %v355_v38, %v314_v33  ;;  %v511_v33 = vadd.s32 160, %v3959_v22 }
  0x3c   : > { %v1248_v8 = vld [vmem:[#allocation2 + $0x41] sm:$0xff]  ;;  %v1249_v54 = vld [vmem:[#allocation2 + $0x49] sm:$0xff]  ;;  %3411 = vmatprep.subr.bf16.mxu0 %v3738_v18  ;;  %v390_v43 = vadd.f32 %v354_v34, %v313_v32  ;;  %v643_v63 = vand.u32 31, %v507_v27  ;;  %v3743_v14 = vld [vmem:[%s5123_s2 + $0x118] sm:$0xff]   ;;  %v359_v32 = vmul.f32 %v4048_v56, %v2980_v21 }
  0x3d   : > { %v4194_v53 = vpack.c.bf16 %v1248_v8, %v1247_v7  ;;  %v1220_v12 = vld [vmem:[#allocation2 + $0x3f] sm:$0xff]  ;;  %v4221_v28 = vpack.c.bf16 %v1250_v16, %v1249_v54  ;;  %v1221_v45 = vld [vmem:[#allocation2 + $0x47] sm:$0xff]  ;;  %v1222_v0 = vld [vmem:[#allocation2 + $0x4f] sm:$0xff]  ;;  %v4251_v51 = vadd.f32 %v432_v41, %v391_v46  ;;  %v392_v7 = vadd.f32 %v356_v2, %v315_v61 }
  0x3e   : > { %v4211_v19 = vpack.c.bf16 %v1220_v12, %v1219_v11  ;;  %3510 = vmatpush3.bf16.msra.mxu1 %v3737_v37  ;;  %v4243_v58 = vadd.f32 %v431_v40, %v390_v43  ;;  %v3014_v60 = vld [vmem:[%s4012_s14 + $0x89] sm:$0xff]  ;;  %v1251_v1 = vld [vmem:[#allocation2 + $0x59] sm:$0xff]  ;;  %v1252_v5 = vld [vmem:[#allocation2 + $0x61] sm:$0xff]  ;;  %v4262_v11 = vpack.c.bf16 %v1222_v0, %v1221_v45  ;;  %vm4266_vm7 = vcmp.ge.s32.totalorder %v643_v63, 1 }
  0x3f   : > { %1510 = vmatprep.mubr.bf16.mxu0 %v4194_v53  ;;  %3511 = vmatprep.subr.bf16.mxu1 %v3740_v42  ;;  %v434_v35 = vmul.f32 %v4053_v57, %v3014_v60  ;;  %1191 = vst [vmem:[#allocation2 + $0x78] sm:$0xff] %v4251_v51  ;;  %v3742_v37 = vld [vmem:[%s5123_s2 + $0x158] sm:$0xff]   ;;  %v4264_v12 = vpack.c.bf16 %v1252_v5, %v1251_v1  ;;  %v202_v16 = vld [vmem:[%s4000_s9 + $0x90] sm:$0xff]  ;;  %v204_v46 = vld [vmem:[%s4000_s9 + $0xa0] sm:$0xff]  ;;  %v671_v0 = vand.u32 31, %v511_v33 }
  0x40   : > { %1511 = vmatmul.mubr.bf16.gmra.mrb[4].mxu0 %v4211_v19  ;;  %1190 = vst [vmem:[#allocation2 + $0x70] sm:$0xff] %v4243_v58  ;;  %v4280_v17 = vadd.f32 %v433_v6, %v392_v7  ;;  %v3015_v24 = vld [vmem:[%s4012_s14 + $0x91] sm:$0xff]  ;;  %v1224_v29 = vld [vmem:[#allocation2 + $0x5f] sm:$0xff]  ;;  %v436_v40 = vmul.f32 %v4053_v57, %v3016_v30  ;;  %v320_v49 = vmul.f32 %v4043_v55, %v204_v46  ;;  %vm4769_vm6 = vmpackc.low %vm3861_vm2, %vm4266_vm7 }
  0x41   : > { %1752 = vmatmul.mubr.bf16.gmra.mrb[4].mxu1 %v1271_v39  ;;  %1518 = vmatprep.mubr.bf16.mxu0 %v4221_v28  ;;  %v1223_v27 = vld [vmem:[#allocation2 + $0x57] sm:$0xff]  ;;  %v435_v38 = vmul.f32 %v4053_v57, %v3015_v24  ;;  %v360_v63 = vmul.f32 %v4048_v56, %v2981_v47  ;;  %v3017_v2 = vld [vmem:[%s4012_s14 + $0xa1] sm:$0xff]  ;;  %vm4348_vm10 = vcmp.ge.s32.totalorder %v671_v0, 1 }
  0x42   : > { %1759 = vmatprep.mubr.bf16.mxu1 %v4144_v23  ;;  %3512 = vmatpush3.bf16.msra.mxu1 %v3741_v44  ;;  %v2978_v23 = vld [vmem:[%s4012_s14 + $0x88] sm:$0xff]  ;;  %v1154_v34 = vsel %vm4270_vm8, %v4280_v17, 0.0  ;;  %v3744_v41 = vld [vmem:[%s5123_s2 + $0x1d8] sm:$0xff]   ;;  %v4322_v1 = vpack.c.bf16 %v1224_v29, %v1223_v27  ;;  %v3748_v47 = vld [vmem:[%s5123_s2 + $0x1e0] sm:$0xff]  }
  0x43   : > { %3412 = vmatpush3.bf16.msra.mxu0 %v3739_v20  ;;  %v357_v3 = vmul.f32 %v4048_v56, %v2978_v23  ;;  %v2979_v20 = vld [vmem:[%s4012_s14 + $0x90] sm:$0xff]  ;;  %v3745_v42 = vld [vmem:[%s5123_s2 + $0x198] sm:$0xff]   ;;  %1192 = vst [vmem:[#allocation2 + $0x80] sm:$0xff] %v1154_v34  ;;  %3513 = vmatprep.subr.bf16.mxu1 %v3744_v41  ;;  %v1225_v29 = vld [vmem:[#allocation2 + $0x67] sm:$0xff] }
  0x44   : > { %3413 = vmatprep.subr.bf16.mxu0 %v3742_v37  ;;  %v358_v31 = vmul.f32 %v4048_v56, %v2979_v20  ;;  %v203_v45 = vld [vmem:[%s4000_s9 + $0x98] sm:$0xff]  ;;  %v205_v20 = vld [vmem:[%s4000_s9 + $0xa8] sm:$0xff]  ;;  %v3768_v54 = vld [vmem:[%s5124_s3 + $0x30] sm:$0xff]  }
  0x45   : > { %v393_v8 = vadd.f32 %v357_v3, %v316_v62  ;;  %v319_v48 = vmul.f32 %v4043_v55, %v203_v45  ;;  %v2982_v62 = vld [vmem:[%s4012_s14 + $0xa8] sm:$0xff]  ;;  %v2984_v26 = vld [vmem:[%s4012_s14 + $0xb8] sm:$0xff]  ;;  %v321_v27 = vmul.f32 %v4043_v55, %v205_v20  ;;  %vm4799_vm8 = vmpackc.low %vm3861_vm2, %vm4348_vm10 }
  0x46   : > { %v394_v43 = vadd.f32 %v358_v31, %v317_v25  ;;  %3514 = vmatpush3.bf16.msra.mxu1 %v3745_v42  ;;  %v3018_v3 = vld [vmem:[%s4012_s14 + $0xa9] sm:$0xff]  ;;  %v361_v5 = vmul.f32 %v4048_v56, %v2982_v62  ;;  %v363_v33 = vmul.f32 %v4048_v56, %v2984_v26  ;;  %v3020_v41 = vld [vmem:[%s4012_s14 + $0xb9] sm:$0xff]  ;;  %v514_v42 = vadd.s32 184, %v3959_v22 }
  0x47   : > { %v4282_v18 = vadd.f32 %v434_v35, %v393_v8  ;;  %3414 = vmatpush3.bf16.msra.mxu0 %v3743_v14  ;;  %v1253_v23 = vld [vmem:[#allocation2 + $0x69] sm:$0xff]  ;;  %v1254_v59 = vld [vmem:[#allocation2 + $0x71] sm:$0xff]  ;;  %v396_v6 = vadd.f32 %v360_v63, %v319_v48  ;;  %v437_v35 = vmul.f32 %v4053_v57, %v3017_v2  ;;  %v438_v7 = vmul.f32 %v4053_v57, %v3018_v3  ;;  %v3746_v8 = vld [vmem:[%s5123_s2 + $0x160] sm:$0xff]  }
  0x48   : > { %1519 = vmatmul.mubr.bf16.gmra.mrb[8].mxu0 %v4262_v11  ;;  %v4316_v60 = vadd.f32 %v435_v38, %v394_v43  ;;  %v4335_v37 = vpack.c.bf16 %v1254_v59, %v1253_v23  ;;  %v397_v14 = vadd.f32 %v361_v5, %v320_v49  ;;  %3415 = vmatprep.subr.bf16.mxu0 %v3746_v8  ;;  %v2983_v25 = vld [vmem:[%s4012_s14 + $0xb0] sm:$0xff]  ;;  %v3749_v49 = vld [vmem:[%s5123_s2 + $0x1a0] sm:$0xff]   ;;  %v3750_v0 = vld [vmem:[%s5123_s2 + $0x168] sm:$0xff]  }
  0x49   : > { %1760 = vmatmul.mubr.bf16.gmra.mrb[8].mxu1 %v4178_v4  ;;  %v318_v4 = vmul.f32 %v4043_v55, %v202_v16  ;;  %1526 = vmatprep.mubr.bf16.mxu0 %v4264_v12  ;;  %v3747_v16 = vld [vmem:[%s5123_s2 + $0x120] sm:$0xff]   ;;  %v4346_v21 = vadd.f32 %v437_v35, %v396_v6  ;;  %v1226_v30 = vld [vmem:[#allocation2 + $0x6f] sm:$0xff]  ;;  %v440_v48 = vmul.f32 %v4053_v57, %v3020_v41  ;;  %v207_v2 = vld [vmem:[%s4000_s9 + $0xb8] sm:$0xff]  ;;  %v5171_v41 = vmov 0 }
  0x4a   : > { %1767 = vmatprep.mubr.bf16.mxu1 %v4194_v53  ;;  %v1155_v53 = vsel %vm4266_vm7, %v4282_v18, 0.0  ;;  %1194 = vst [vmem:[#allocation2 + $0x90] sm:$0xff] %v4316_v60  ;;  %v1255_v34 = vld [vmem:[#allocation2 + $0x79] sm:$0xff]  ;;  %3515 = vmatprep.subr.bf16.mxu1 %v3748_v47  ;;  %v4383_v59 = vpack.c.bf16 %v1226_v30, %v1225_v29  ;;  %v2986_v6 = vld [vmem:[%s4012_s14 + $0xc8] sm:$0xff]  ;;  %v2987_v47 = vld [vmem:[%s4012_s14 + $0xd0] sm:$0xff] }
  0x4b   : > { %1193 = vst [vmem:[#allocation2 + $0x88] sm:$0xff] %v1155_v53  ;;  %v395_v44 = vadd.f32 %v359_v32, %v318_v4  ;;  %v4356_v4 = vadd.f32 %v438_v7, %v397_v14  ;;  %3416 = vmatpush3.bf16.msra.mxu0 %v3747_v16  ;;  %v362_v32 = vmul.f32 %v4048_v56, %v2983_v25  ;;  %v1158_v38 = vsel %vm4337_vm9, %v4346_v21, 0.0  ;;  %v208_v3 = vld [vmem:[%s4000_s9 + $0xc0] sm:$0xff]  ;;  %v3022_v20 = vld [vmem:[%s4012_s14 + $0xc9] sm:$0xff]  ;;  %vm4783_vm7 = vmpackc.low %vm4337_vm9, %vm3861_vm2 }
  0x4c   : > { %1196 = vst [vmem:[#allocation2 + $0xa0] sm:$0xff] %v1158_v38  ;;  %3516 = vmatpush3.bf16.msra.mxu1 %v3749_v49  ;;  %v2985_v5 = vld [vmem:[%s4012_s14 + $0xc0] sm:$0xff]  ;;  %v323_v7 = vmul.f32 %v4043_v55, %v207_v2  ;;  %v324_v8 = vmul.f32 %v4043_v55, %v208_v3  ;;  %v692_v14 = vand.u32 31, %v514_v42  ;;  %v699_v16 = vand.u32 31, %v515_v50  ;;  %3417 = vmatprep.subr.bf16.mxu0 %v3750_v0  ;;  %v3752_v42 = vld [vmem:[%s5123_s2 + $0x1e8] sm:$0xff]   ;;  %v3023_v2 = vld [vmem:[%s4012_s14 + $0xd1] sm:$0xff] }
  0x4d   : > { %v4318_v61 = vadd.f32 %v436_v40, %v395_v44  ;;  %v3019_v40 = vld [vmem:[%s4012_s14 + $0xb1] sm:$0xff]  ;;  %v1159_v43 = vsel %vm4348_vm10, %v4356_v4, 0.0  ;;  %v398_v44 = vadd.f32 %v362_v32, %v321_v27  ;;  %v3021_v35 = vld [vmem:[%s4012_s14 + $0xc1] sm:$0xff]  ;;  %v365_v25 = vmul.f32 %v4048_v56, %v2986_v6  ;;  %3517 = vmatprep.subr.bf16.mxu1 %v3752_v42 }
  0x4e   : > { %v439_v46 = vmul.f32 %v4053_v57, %v3019_v40  ;;  %1197 = vst [vmem:[#allocation2 + $0xa8] sm:$0xff] %v1159_v43  ;;  %v441_v26 = vmul.f32 %v4053_v57, %v3021_v35  ;;  %v1227_v27 = vld [vmem:[#allocation2 + $0x77] sm:$0xff]  ;;  %v1228_v29 = vld [vmem:[#allocation2 + $0x7f] sm:$0xff]  ;;  %v442_v30 = vmul.f32 %v4053_v57, %v3022_v20  ;;  %v4414_v38 = vadd.s32 216, %v3959_v22  ;;  %v209_v43 = vld [vmem:[%s4000_s9 + $0xc8] sm:$0xff] }
  0x4f   : > { %1195 = vst [vmem:[#allocation2 + $0x98] sm:$0xff] %v4318_v61  ;;  %vm4416_vm11 = vcmp.ge.s32.totalorder %v699_v16, 1  ;;  %v5168_v40 = vmov 0  ;;  %vm4420_vm12 = vcmp.le.s32.totalorder %v692_v14, 28  ;;  %v325_v49 = vmul.f32 %v4043_v55, %v209_v43  ;;  %v3024_v14 = vld [vmem:[%s4012_s14 + $0xd9] sm:$0xff] }
  0x50   : > { %1527 = vmatmul.mubr.bf16.gmra.mrb[12].mxu0 %v4322_v1  ;;  %v4381_v23 = vadd.f32 %v439_v46, %v398_v44  ;;  %v5169_v40 = vsel %vm4416_vm11, 4294967295, %v5168_v40  ;;  %v5172_v41 = vsel %vm4420_vm12, 4294967295, %v5171_v41  ;;  %v210_v46 = vld [vmem:[%s4000_s9 + $0xd0] sm:$0xff]  ;;  %v519_v50 = vadd.s32 224, %v3959_v22  ;;  %v211_v42 = vld [vmem:[%s4000_s9 + $0xd8] sm:$0xff]  ;;  %v212_v43 = vld [vmem:[%s4000_s9 + $0xe0] sm:$0xff] }
  0x51   : > { %1768 = vmatmul.mubr.bf16.gmra.mrb[12].mxu1 %v4211_v19  ;;  %v206_v19 = vld [vmem:[%s4000_s9 + $0xb0] sm:$0xff]  ;;  %1534 = vmatprep.mubr.bf16.mxu0 %v4335_v37  ;;  %5170 = vst [vmem:[#allocation4_spill] sm:$0xff] %v5169_v40  ;;  %5173 = vst [vmem:[#allocation5_spill] sm:$0xff] %v5172_v41  ;;  %v4437_v0 = vpack.c.bf16 %v1228_v29, %v1227_v27  ;;  %v326_v3 = vmul.f32 %v4043_v55, %v210_v46  ;;  %v2989_v46 = vld [vmem:[%s4012_s14 + $0xe0] sm:$0xff] }
  0x52   : > { %1775 = vmatprep.mubr.bf16.mxu1 %v4221_v28  ;;  %v322_v31 = vmul.f32 %v4043_v55, %v206_v19  ;;  %v1256_v53 = vld [vmem:[#allocation2 + $0x81] sm:$0xff]  ;;  %1198 = vst [vmem:[#allocation2 + $0xb0] sm:$0xff] %v4381_v23  ;;  %v364_v19 = vmul.f32 %v4048_v56, %v2985_v5  ;;  %v1257_v32 = vld [vmem:[#allocation2 + $0x89] sm:$0xff]  ;;  %v366_v5 = vmul.f32 %v4048_v56, %v2987_v47  ;;  %v720_v47 = vand.u32 31, %v4414_v38  ;;  %vm4814_vm9 = vmpackc.low %vm4420_vm12, %vm3861_vm2 }
  0x53   : > { %v4388_v63 = vpack.c.bf16 %v1256_v53, %v1255_v34  ;;  %v401_v53 = vadd.f32 %v365_v25, %v324_v8  ;;  %v443_v16 = vmul.f32 %v4053_v57, %v3023_v2  ;;  %v444_v25 = vmul.f32 %v4053_v57, %v3024_v14  ;;  %v1229_v27 = vld [vmem:[#allocation2 + $0x87] sm:$0xff]  ;;  %v1230_v29 = vld [vmem:[#allocation2 + $0x8f] sm:$0xff]  ;;  %vm4829_vm10 = vmpackc.low %vm3861_vm2, %vm4416_vm11 }
  0x54   : > { %v399_v45 = vadd.f32 %v363_v33, %v322_v31  ;;  %v3751_v31 = vld [vmem:[%s5123_s2 + $0x128] sm:$0xff]   ;;  %v400_v34 = vadd.f32 %v364_v19, %v323_v7  ;;  %v402_v20 = vadd.f32 %v366_v5, %v325_v49  ;;  %v327_v5 = vmul.f32 %v4043_v55, %v211_v42  ;;  %v2991_v42 = vld [vmem:[%s4012_s14 + $0xf0] sm:$0xff] }
  0x55   : > { %3418 = vmatpush3.bf16.msra.mxu0 %v3751_v31  ;;  %v2990_v49 = vld [vmem:[%s4012_s14 + $0xe8] sm:$0xff]  ;;  %vm4497_vm13 = vcmp.le.s32.totalorder %v720_v47, 28  ;;  %v4519_v47 = vld [vmem:[%s5122_s1] ss:$0 sm:$0xff] }
  0x56   : > { %v4385_v62 = vadd.f32 %v440_v48, %v399_v45  ;;  %v1258_v33 = vld [vmem:[#allocation2 + $0x91] sm:$0xff]  ;;  %v4428_v44 = vadd.f32 %v441_v26, %v400_v34  ;;  %v4430_v45 = vadd.f32 %v442_v30, %v401_v53  ;;  %v3753_v26 = vld [vmem:[%s5123_s2 + $0x1a8] sm:$0xff]   ;;  %v1259_v31 = vld [vmem:[#allocation2 + $0x99] sm:$0xff] }
  0x57   : > { %v2988_v48 = vld [vmem:[%s4012_s14 + $0xd8] sm:$0xff]  ;;  %v4444_v35 = vpack.c.bf16 %v1258_v33, %v1257_v32  ;;  %v3754_v30 = vld [vmem:[%s5123_s2 + $0x170] sm:$0xff]   ;;  %v1260_v32 = vld [vmem:[#allocation2 + $0xa1] sm:$0xff]  ;;  %v4463_v33 = vadd.f32 %v443_v16, %v402_v20  ;;  %3518 = vmatpush3.bf16.msra.mxu1 %v3753_v26  ;;  %v4489_v16 = vpack.c.bf16 %v1230_v29, %v1229_v27  ;;  %v5182_v29 = vmov 0 }
  0x58   : > { %5167 = vst [vmem:[#allocation3_spill] sm:$0xff] %v4385_v62  ;;  %1199 = vst [vmem:[#allocation2 + $0xb8] sm:$0xff] %v4385_v62  ;;  %1535 = vmatmul.mubr.bf16.gmra.mrb[16].mxu0 %v4383_v59  ;;  %v367_v6 = vmul.f32 %v4048_v56, %v2988_v48  ;;  %v1162_v7 = vsel %vm4420_vm12, %v4428_v44, 0.0  ;;  %v1163_v8 = vsel %vm4416_vm11, %v4430_v45, 0.0  ;;  %v3755_v53 = vld [vmem:[%s5123_s2 + $0x130] sm:$0xff]   ;;  %3419 = vmatprep.subr.bf16.mxu0 %v3754_v30  ;;  %v727_v48 = vand.u32 31, %v519_v50 }
  0x59   : > { %1776 = vmatmul.mubr.bf16.gmra.mrb[16].mxu1 %v4262_v11  ;;  %1542 = vmatprep.mubr.bf16.mxu0 %v4388_v63  ;;  %5174 = vst [vmem:[#allocation6_spill] sm:$0xff] %v4428_v44  ;;  %5175 = vst [vmem:[#allocation7_spill] sm:$0xff] %v4430_v45  ;;  %v3025_v2 = vld [vmem:[%s4012_s14 + $0xe1] sm:$0xff]  ;;  %v3756_v50 = vld [vmem:[%s5123_s2 + $0x1f0] sm:$0xff]  }
  0x5a   : > { %1783 = vmatprep.mubr.bf16.mxu1 %v4264_v12  ;;  %1200 = vst [vmem:[#allocation2 + $0xc0] sm:$0xff] %v1162_v7  ;;  %1201 = vst [vmem:[#allocation2 + $0xc8] sm:$0xff] %v1163_v8  ;;  %v403_v19 = vadd.f32 %v367_v6, %v326_v3  ;;  %3420 = vmatpush3.bf16.msra.mxu0 %v3755_v53  ;;  %v3026_v3 = vld [vmem:[%s4012_s14 + $0xe9] sm:$0xff]  ;;  %v328_v6 = vmul.f32 %v4043_v55, %v212_v43  ;;  %v1232_v26 = vld [vmem:[#allocation2 + $0x9f] sm:$0xff]  ;;  %vm4504_vm14 = vcmp.ge.s32.totalorder %v727_v48, 1 }
  0x5b   : > { %5176 = vst [vmem:[#allocation8_spill] sm:$0xff] %v4463_v33  ;;  %1202 = vst [vmem:[#allocation2 + $0xd0] sm:$0xff] %v4463_v33  ;;  %v368_v7 = vmul.f32 %v4048_v56, %v2989_v46  ;;  %v369_v8 = vmul.f32 %v4048_v56, %v2990_v49  ;;  %v445_v14 = vmul.f32 %v4053_v57, %v3025_v2  ;;  %v3757_v55 = vld [vmem:[%s5123_s2 + $0x1b0] sm:$0xff]   ;;  %3519 = vmatprep.subr.bf16.mxu1 %v3756_v50  ;;  %v213_v30 = vld [vmem:[%s4000_s9 + $0xe8] sm:$0xff] }
  0x5c   : > { %v4465_v34 = vadd.f32 %v444_v25, %v403_v19  ;;  %v446_v38 = vmul.f32 %v4053_v57, %v3026_v3  ;;  %v4495_v56 = vpack.c.bf16 %v1260_v32, %v1259_v31  ;;  %v5178_v19 = vmov 0  ;;  %v1231_v25 = vld [vmem:[#allocation2 + $0x97] sm:$0xff]  ;;  %3520 = vmatpush3.bf16.msra.mxu1 %v3757_v55  ;;  %v1261_v50 = vld [vmem:[#allocation2 + $0xa9] sm:$0xff]  ;;  %vm4844_vm11 = vmpackc.low %vm4497_vm13, %vm3861_vm2 }
  0x5d   : > { %v404_v20 = vadd.f32 %v368_v7, %v327_v5  ;;  %v405_v57 = vadd.f32 %v369_v8, %v328_v6  ;;  %v5179_v19 = vsel %vm4497_vm13, 4294967295, %v5178_v19  ;;  %v5183_v29 = vsel %vm4504_vm14, 4294967295, %v5182_v29  ;;  %v214_v31 = vld [vmem:[%s4000_s9 + $0xf0] sm:$0xff]  ;;  %v2992_v43 = vld [vmem:[%s4012_s14 + $0xf8] sm:$0xff]  ;;  %v4532_v6 = vld [vmem:[%s5122_s1 + $0x1] ss:$0 sm:$0xff] }
  0x5e   : > { %5177 = vst [vmem:[#allocation9_spill] sm:$0xff] %v4465_v34  ;;  %1203 = vst [vmem:[#allocation2 + $0xd8] sm:$0xff] %v4465_v34  ;;  %v522_v32 = vadd.s32 248, %v3959_v22  ;;  %v3027_v46 = vld [vmem:[%s4012_s14 + $0xf1] sm:$0xff]  ;;  %v329_v48 = vmul.f32 %v4519_v47, %v213_v30  ;;  %v330_v49 = vmul.f32 %v4519_v47, %v214_v31  ;;  %v523_v2 = vadd.s32 256, %v3959_v22  ;;  %v3028_v5 = vld [vmem:[%s4012_s14 + $0xf9] sm:$0xff] }
  0x5f   : > { %5180 = vst [vmem:[#allocation10_spill] sm:$0xff] %v5179_v19  ;;  %v4502_v27 = vadd.f32 %v445_v14, %v404_v20  ;;  %5184 = vst [vmem:[#allocation12_spill] sm:$0xff] %v5183_v29  ;;  %v4511_v53 = vadd.f32 %v446_v38, %v405_v57  ;;  %v370_v7 = vmul.f32 %v4532_v6, %v2991_v42  ;;  %v4539_v14 = vld [vmem:[%s5122_s1 + $0x2] ss:$0 sm:$0xff]  ;;  %v1262_v20 = vld [vmem:[#allocation2 + $0xb1] sm:$0xff] }
  0x60   : > { %1543 = vmatmul.mubr.bf16.gmra.mrb[20].mxu0 %v4437_v0  ;;  %v371_v8 = vmul.f32 %v4532_v6, %v2992_v43  ;;  %v447_v38 = vmul.f32 %v4539_v14, %v3027_v46  ;;  %v448_v57 = vmul.f32 %v4539_v14, %v3028_v5  ;;  %v3758_v42 = vld [vmem:[%s5123_s2 + $0x178] sm:$0xff]   ;;  %v4550_v43 = vpack.c.bf16 %v1232_v26, %v1231_v25  ;;  %v3029_v26 = vld [vmem:[%s4012_s14 + $0x101] sm:$0xff]  ;;  %v5213_v24 = vld [vmem:[#allocation3_spill] sm:$0xff] }
  0x61   : > { %1784 = vmatmul.mubr.bf16.gmra.mrb[20].mxu1 %v4322_v1  ;;  %1550 = vmatprep.mubr.bf16.mxu0 %v4444_v35  ;;  %5181 = vst [vmem:[#allocation11_spill] sm:$0xff] %v4502_v27  ;;  %5185 = vst [vmem:[#allocation13_spill] sm:$0xff] %v4511_v53  ;;  %v1166_v3 = vsel %vm4497_vm13, %v4502_v27, 0.0  ;;  %v1167_v55 = vsel %vm4504_vm14, %v4511_v53, 0.0  ;;  %v406_v30 = vadd.f32 %v370_v7, %v329_v48  ;;  %v3759_v46 = vld [vmem:[%s5123_s2 + $0x138] sm:$0xff]   ;;  %v748_v53 = vand.u32 31, %v522_v32 }
  0x62   : > { %1791 = vmatprep.mubr.bf16.mxu1 %v4335_v37  ;;  %1204 = vst [vmem:[#allocation2 + $0xe0] sm:$0xff] %v1166_v3  ;;  %1205 = vst [vmem:[#allocation2 + $0xe8] sm:$0xff] %v1167_v55  ;;  %v407_v31 = vadd.f32 %v371_v8, %v330_v49  ;;  %v215_v3 = vld [vmem:[%s4000_s9 + $0xf8] sm:$0xff]  ;;  %v755_v29 = vand.u32 31, %v523_v2  ;;  %v4556_v5 = vpack.c.bf16 %v1262_v20, %v1261_v50  ;;  %3421 = vmatprep.subr.bf16.mxu0 %v3758_v42  ;;  %v216_v49 = vld [vmem:[%s4000_s9 + $0x100] sm:$0xff] }
  0x63   : > { %v4558_v55 = vadd.f32 %v447_v38, %v406_v30  ;;  %v2993_v7 = vld [vmem:[%s4012_s14 + $0x100] sm:$0xff]  ;;  %v2994_v8 = vld [vmem:[%s4012_s14 + $0x108] sm:$0xff]  ;;  %v331_v25 = vmul.f32 %v4519_v47, %v215_v3  ;;  %3422 = vmatpush3.bf16.msra.mxu0 %v3759_v46  ;;  %v332_v32 = vmul.f32 %v4519_v47, %v216_v49  ;;  %v449_v50 = vmul.f32 %v4539_v14, %v3029_v26  ;;  %v3761_v42 = vld [vmem:[%s5123_s2 + $0x1b8] sm:$0xff]  }
  0x64   : > { %v4560_v48 = vadd.f32 %v448_v57, %v407_v31  ;;  %v3030_v27 = vld [vmem:[%s4012_s14 + $0x109] sm:$0xff]  ;;  %v372_v2 = vmul.f32 %v4532_v6, %v2993_v7  ;;  %v373_v38 = vmul.f32 %v4532_v6, %v2994_v8  ;;  %v3760_v57 = vld [vmem:[%s5123_s2 + $0x1f8] sm:$0xff]   ;;  %vm4584_vm15 = vcmp.ge.s32.totalorder %v755_v29, 1  ;;  %v1264_v8 = vld [vmem:[#allocation2 + $0xc1] sm:$0xff] }
  0x65   : > { %5186 = vst [vmem:[#allocation14_spill] sm:$0xff] %v4558_v55  ;;  %1206 = vst [vmem:[#allocation2 + $0xf0] sm:$0xff] %v4558_v55  ;;  %v450_v20 = vmul.f32 %v4539_v14, %v3030_v27  ;;  %v1233_v46 = vld [vmem:[#allocation2 + $0xa7] sm:$0xff]  ;;  %v5188_v3 = vmov 0  ;;  %vm4588_vm0 = vcmp.le.s32.totalorder %v748_v53, 28  ;;  %v5191_v49 = vmov 0  ;;  %3521 = vmatprep.subr.bf16.mxu1 %v3760_v57 }
  0x66   : > { %5187 = vst [vmem:[#allocation15_spill] sm:$0xff] %v4560_v48  ;;  %1207 = vst [vmem:[#allocation2 + $0xf8] sm:$0xff] %v4560_v48  ;;  %v408_v30 = vadd.f32 %v372_v2, %v331_v25  ;;  %v409_v31 = vadd.f32 %v373_v38, %v332_v32  ;;  %v5189_v3 = vsel %vm4584_vm15, 4294967295, %v5188_v3  ;;  %v5192_v49 = vsel %vm4588_vm0, 4294967295, %v5191_v49  ;;  %v1234_v27 = vld [vmem:[#allocation2 + $0xaf] sm:$0xff]  ;;  %v1263_v7 = vld [vmem:[#allocation2 + $0xb9] sm:$0xff]  ;;  %3522 = vmatpush3.bf16.msra.mxu1 %v3761_v42 }
  0x67   : > { %5190 = vst [vmem:[#allocation16_spill] sm:$0xff] %v5189_v3  ;;  %5193 = vst [vmem:[#allocation17_spill] sm:$0xff] %v5192_v49  ;;  %v4600_v29 = vld [vmem:[%s5124_s3] sm:$0xff]   ;;  %v4608_v2 = vpack.c.bf16 %v1234_v27, %v1233_v46  ;;  %v4613_v38 = vpack.c.bf16 %v1264_v8, %v1263_v7  ;;  %v1265_v57 = vld [vmem:[#allocation2 + $0xc9] sm:$0xff]  ;;  %v526_v3 = vadd.s32 280, %v3959_v22 }
  0x68   : > { %1551 = vmatmul.mubr.bf16.gmra.mrb[24].mxu0 %v4489_v16  ;;  %v4593_v25 = vadd.f32 %v449_v50, %v408_v30  ;;  %v4595_v26 = vadd.f32 %v450_v20, %v409_v31  ;;  %3629 = vmatprep.subr.bf16.mxu0 %v4600_v29  ;;  %v1235_v50 = vld [vmem:[#allocation2 + $0xb7] sm:$0xff]  ;;  %v1236_v20 = vld [vmem:[#allocation2 + $0xbf] sm:$0xff]  ;;  %v217_v46 = vld [vmem:[%s4000_s9 + $0x108] sm:$0xff] }
  0x69   : > { %1792 = vmatmul.mubr.bf16.gmra.mrb[24].mxu1 %v4383_v59  ;;  %1558 = vmatprep.mubr.bf16.mxu0 %v4495_v56  ;;  %v1266_v30 = vld [vmem:[#allocation2 + $0xd1] sm:$0xff]  ;;  %v4618_v31 = vpack.c.bf16 %v1236_v20, %v1235_v50  ;;  %v3032_v50 = vld [vmem:[%s4012_s14 + $0x119] sm:$0xff]  ;;  %v3033_v55 = vld [vmem:[%s4012_s14 + $0x121] sm:$0xff]  ;;  %v776_v45 = vand.u32 31, %v526_v3 }
  0x6a   : > { %1799 = vmatprep.mubr.bf16.mxu1 %v4388_v63  ;;  %5194 = vst [vmem:[#allocation18_spill] sm:$0xff] %v4593_v25  ;;  %5195 = vst [vmem:[#allocation19_spill] sm:$0xff] %v4595_v26  ;;  %v1170_v53 = vsel %vm4588_vm0, %v4593_v25, 0.0  ;;  %v1171_v32 = vsel %vm4584_vm15, %v4595_v26, 0.0  ;;  %3673 = vmatprep.subr.bf16.mxu1 %v4600_v29  ;;  %v4621_v42 = vpack.c.bf16 %v1266_v30, %v1265_v57  ;;  %v218_v27 = vld [vmem:[%s4000_s9 + $0x110] sm:$0xff]  ;;  %v2996_v8 = vld [vmem:[%s4012_s14 + $0x118] sm:$0xff] }
  0x6b   : > { %1208 = vst [vmem:[#allocation2 + $0x100] sm:$0xff] %v1170_v53  ;;  %1209 = vst [vmem:[#allocation2 + $0x108] sm:$0xff] %v1171_v32  ;;  %v2995_v7 = vld [vmem:[%s4012_s14 + $0x110] sm:$0xff]  ;;  %v333_v32 = vmul.f32 %v4519_v47, %v217_v46  ;;  %v334_v26 = vmul.f32 %v4519_v47, %v218_v27  ;;  %v375_v57 = vmul.f32 %v4532_v6, %v2996_v8  ;;  %v219_v48 = vld [vmem:[%s4000_s9 + $0x118] sm:$0xff]  ;;  %vm4651_vm1 = vcmp.le.s32.totalorder %v776_v45, 28 }
  0x6c   : > { %v3031_v53 = vld [vmem:[%s4012_s14 + $0x111] sm:$0xff]  ;;  %v374_v20 = vmul.f32 %v4532_v6, %v2995_v7  ;;  %v452_v25 = vmul.f32 %v4539_v14, %v3032_v50  ;;  %v2997_v49 = vld [vmem:[%s4012_s14 + $0x120] sm:$0xff]  ;;  %v335_v7 = vmul.f32 %v4519_v47, %v219_v48  ;;  %v453_v22 = vmul.f32 %v4539_v14, %v3033_v55  ;;  %vm4862_vm12 = vmpackc.low %vm3861_vm2, %vm4504_vm14 }
  0x6d   : > { %v451_v30 = vmul.f32 %v4539_v14, %v3031_v53  ;;  %v1237_v46 = vld [vmem:[#allocation2 + $0xc7] sm:$0xff]  ;;  %v1238_v27 = vld [vmem:[#allocation2 + $0xcf] sm:$0xff]  ;;  %v411_v19 = vadd.f32 %v375_v57, %v334_v26  ;;  %v376_v8 = vmul.f32 %v4532_v6, %v2997_v49  ;;  %v1267_v53 = vld [vmem:[#allocation2 + $0xd9] sm:$0xff] }
  0x6e   : > { %v410_v34 = vadd.f32 %v374_v20, %v333_v32  ;;  %v1268_v33 = vld [vmem:[#allocation2 + $0xe1] sm:$0xff]  ;;  %v4649_v62 = vpack.c.bf16 %v1238_v27, %v1237_v46  ;;  %v1239_v45 = vld [vmem:[#allocation2 + $0xd7] sm:$0xff]  ;;  %v1330_v3 = vld [vmem:[#allocation2 + $0xef] sm:$0xff] }
  0x6f   : > { %v4647_v50 = vadd.f32 %v452_v25, %v411_v19  ;;  %v412_v44 = vadd.f32 %v376_v8, %v335_v7  ;;  %v4656_v47 = vpack.c.bf16 %v1268_v33, %v1267_v53  ;;  %v1240_v33 = vld [vmem:[#allocation2 + $0xdf] sm:$0xff]  ;;  %v1333_v19 = vld [vmem:[#allocation2 + $0xe9] sm:$0xff]  ;;  %v1334_v14 = vld [vmem:[#allocation2 + $0xf1] sm:$0xff] }
  0x70   : > { %1559 = vmatmul.mubr.bf16.gmra.mrb[28].mxu0 %v4550_v43  ;;  %v4645_v40 = vadd.f32 %v451_v30, %v410_v34  ;;  %v4668_v55 = vpack.c.bf16 %v1240_v33, %v1239_v45  ;;  %v1329_v48 = vld [vmem:[#allocation2 + $0xe7] sm:$0xff]  ;;  %v1331_v57 = vld [vmem:[#allocation2 + $0xf7] sm:$0xff]  ;;  %v4707_v33 = vpack.c.bf16 %v4184_v9, %v4156_v36  ;;  %vm4880_vm13 = vmpackc.low %vm4588_vm0, %vm3861_vm2 }
  0x71   : > { %1800 = vmatmul.mubr.bf16.gmra.mrb[28].mxu1 %v4437_v0  ;;  %1566 = vmatprep.mubr.bf16.mxu0 %v4556_v5  ;;  %1211 = vst [vmem:[#allocation2 + $0x118] sm:$0xff] %v4647_v50  ;;  %v4660_v6 = vadd.f32 %v453_v22, %v412_v44  ;;  %v4671_v44 = vpack.c.bf16 %v1334_v14, %v1333_v19  ;;  %v4682_v20 = vld [vmem:[#allocation2 + $0x48] sm:$0xff]  ;;  %v3773_v46 = vld [vmem:[#allocation2 + $0x50] sm:$0xff]  ;;  %v2245_v19 = vld [vmem:[#allocation2 + $0x20] sm:$0xff] }
  0x72   : > { %1807 = vmatprep.mubr.bf16.mxu1 %v4444_v35  ;;  %1210 = vst [vmem:[#allocation2 + $0x110] sm:$0xff] %v4645_v40  ;;  %v1335_v49 = vld [vmem:[#allocation2 + $0xf9] sm:$0xff]  ;;  %v1336_v25 = vld [vmem:[#allocation2 + $0x101] sm:$0xff]  ;;  %v4676_v26 = vpack.c.bf16 %v1330_v3, %v1329_v48  ;;  %v4687_v27 = vpack.c.bf16 %v3773_v46, %v4682_v20  ;;  %v2243_v53 = vld [vmem:[#allocation2 + $0x10] sm:$0xff] }
  0x73   : > { %v1174_v34 = vsel %vm4651_vm1, %v4660_v6, 0.0  ;;  %v4679_v32 = vpack.c.bf16 %v1336_v25, %v1335_v49  ;;  %v1332_v30 = vld [vmem:[#allocation2 + $0xff] sm:$0xff]  ;;  %v2242_v8 = vld [vmem:[#allocation2 + $0x8] sm:$0xff]  ;;  %vm3828_vm14 = vmpackc.low %vm3861_vm2, %vm4584_vm15 }
  0x74   : > { %1212 = vst [vmem:[#allocation2 + $0x120] sm:$0xff] %v1174_v34  ;;  %v4689_v7 = vpack.c.bf16 %v1332_v30, %v1331_v57  ;;  %v2278_v22 = vpack.c.bf16 %v2243_v53, %v2242_v8  ;;  %v3763_v34 = vld [vmem:[%s5124_s3 + $0x8] sm:$0xff]   ;;  %v3765_v9 = vld [vmem:[%s5124_s3 + $0x18] sm:$0xff]   ;;  %v2249_v3 = vld [vmem:[#allocation2 + $0x40] sm:$0xff] }
  0x75   : > { %v5228_v57 = vld [vmem:[#allocation13_spill] sm:$0xff]  ;;  %v5229_v30 = vld [vmem:[#allocation14_spill] sm:$0xff]  ;;  %v5236_v45 = vld [vmem:[#allocation19_spill] sm:$0xff] }
  0x76   : > { %v4868_v46 = vpack.c.bf16 %v5229_v30, %v5228_v57  ;;  %v5234_v8 = vld [vmem:[#allocation18_spill] sm:$0xff]  ;;  %vm3834_vm15 = vmpackc.low %vm4651_vm1, %vm3861_vm2 }
  0x78   : > { %1567 = vmatmul.mubr.bf16.gmra.mrb[32].mxu0 %v4608_v2 }
  0x79   : > { %1808 = vmatmul.mubr.bf16.gmra.mrb[32].mxu1 %v4489_v16  ;;  %1574 = vmatprep.mubr.bf16.mxu0 %v4613_v38 }
  0x7a   : > { %1815 = vmatprep.mubr.bf16.mxu1 %v4495_v56 }
  0x80   : > { %1575 = vmatmul.mubr.bf16.gmra.mrb[36].mxu0 %v4618_v31 }
  0x81   : > { %1816 = vmatmul.mubr.bf16.gmra.mrb[36].mxu1 %v4550_v43  ;;  %1582 = vmatprep.mubr.bf16.mxu0 %v4621_v42 }
  0x82   : > { %1823 = vmatprep.mubr.bf16.mxu1 %v4556_v5 }
  0x88   : > { %1583 = vmatmul.mubr.bf16.gmra.mrb[40].mxu0 %v4649_v62 }
  0x89   : > { %1824 = vmatmul.mubr.bf16.gmra.mrb[40].mxu1 %v4608_v2  ;;  %1590 = vmatprep.mubr.bf16.mxu0 %v4656_v47 }
  0x8a   : > { %1831 = vmatprep.mubr.bf16.mxu1 %v4613_v38 }
  0x90   : > { %1591 = vmatmul.mubr.bf16.gmra.mrb[44].mxu0 %v4668_v55 }
  0x91   : > { %1832 = vmatmul.mubr.bf16.gmra.mrb[44].mxu1 %v4618_v31  ;;  %1598 = vmatprep.mubr.bf16.mxu0 %v4671_v44 }
  0x92   : > { %1839 = vmatprep.mubr.bf16.mxu1 %v4621_v42 }
  0x98   : > { %1599 = vmatmul.mubr.bf16.gmra.mrb[48].mxu0 %v4676_v26 }
  0x99   : > { %1840 = vmatmul.mubr.bf16.gmra.mrb[48].mxu1 %v4649_v62  ;;  %1606 = vmatprep.mubr.bf16.mxu0 %v4679_v32 }
  0x9a   : > { %1847 = vmatprep.mubr.bf16.mxu1 %v4656_v47 }
  0xa0   : > { %1607 = vmatmul.mubr.bf16.gmra.mrb[52].mxu0 %v4689_v7 }
  0xa1   : > { %1848 = vmatmul.mubr.bf16.gmra.mrb[52].mxu1 %v4668_v55  ;;  %2101 = vmatprep.mubr.bf16.mxu0 %v4221_v28  ;;  %v2244_v28 = vld [vmem:[#allocation2 + $0x18] sm:$0xff] }
  0xa2   : > { %2457 = vmatprep.mubr.bf16.mxu1 %v4687_v27  ;;  %v2280_v36 = vpack.c.bf16 %v2245_v19, %v2244_v28  ;;  %v1881_v28 = vld [vmem:[#allocation2 + $0x10f] sm:$0xff]  ;;  %v1911_v19 = vld [vmem:[#allocation2 + $0x121] sm:$0xff] }
  0xa8   : > { %2102 = vmatmul.mubr.bf16.vlgmr.msra.gmra.mrb[56].mxu0 %v4262_v11  ;;  %v3778_v11 = vpack.c.bf16 %v4243_v58, %v4196_v13  ;;  %v3767_v13 = vld [vmem:[%s5124_s3 + $0x28] sm:$0xff]  }
  0xa9   : > { %2458 = vmatmul.mubr.bf16.vlgmr.msra.gmra.mrb[56].mxu1 %v2278_v22  ;;  %3630 = vmatpush3.bf16.msra.mxu0 %v4600_v29 }
  0xaa   : > { %3776 = vmatprep.mubr.msk.bf16.mxu1 %vm4701_vm3, %v4707_v33  ;;  %3681 = vmatpush3.bf16.msra.mxu1 %v4600_v29  ;;  %v2247_v29 = vld [vmem:[#allocation2 + $0x30] sm:$0xff] }
  0xab   : > { %3674 = vmatprep.subr.bf16.mxu1 %v3763_v34  ;;  %2109 = vmatprep.mubr.bf16.mxu0 %v4264_v12  ;;  %v2246_v12 = vld [vmem:[#allocation2 + $0x28] sm:$0xff] }
  0xac   : > { %3631 = vmatprep.subr.bf16.mxu0 %v3763_v34  ;;  %v4738_v48 = vpack.c.bf16 %v2247_v29, %v2246_v12  ;;  %v1882_v12 = vld [vmem:[#allocation2 + $0x117] sm:$0xff]  ;;  %v1883_v29 = vld [vmem:[#allocation2 + $0x11f] sm:$0xff] }
  0xad   : > { %3632 = vmatpush3.bf16.msra.mxu0 %v3763_v34 }
  0xae   : > { %3682 = vmatpush3.bf16.msra.mxu1 %v3763_v34  ;;  %3633 = vmatprep.subr.bf16.mxu0 %v3764_v52 }
  0xaf   : > { %3675 = vmatprep.subr.bf16.mxu1 %v3764_v52 }
  0xb0   : > { %2110 = vmatmul.mubr.bf16.gmra.mrb[60].mxu0 %v4322_v1  ;;  %v3781_v1 = vpack.c.bf16 %v4280_v17, %v4251_v51  ;;  %v3769_v51 = vld [vmem:[%s5124_s3 + $0x38] sm:$0xff]  }
  0xb1   : > { %2466 = vmatmul.mubr.bf16.gmra.mrb[60].mxu1 %v2280_v36  ;;  %2117 = vmatprep.mubr.bf16.mxu0 %v4335_v37  ;;  %v2248_v37 = vld [vmem:[#allocation2 + $0x38] sm:$0xff] }
  0xb2   : > { %3779 = vmatprep.mubr.msk.bf16.mxu1 %vm4725_vm4, %v3778_v11  ;;  %3683 = vmatpush3.bf16.msra.mxu1 %v3764_v52  ;;  %v4760_v49 = vpack.c.bf16 %v2249_v3, %v2248_v37 }
  0xb3   : > { %3676 = vmatprep.subr.bf16.mxu1 %v3765_v9  ;;  %3634 = vmatpush3.bf16.msra.mxu0 %v3764_v52 }
  0xb4   : > { %3635 = vmatprep.subr.bf16.mxu0 %v3765_v9 }
  0xb6   : > { %3684 = vmatpush3.bf16.msra.mxu1 %v3765_v9 }
  0xb7   : > { %3677 = vmatprep.subr.bf16.mxu1 %v3766_v10  ;;  %3636 = vmatpush3.bf16.msra.mxu0 %v3765_v9  ;;  %v2614_v9 = vld [vmem:[#allocation2 + $0xa8] sm:$0xff] }
  0xb8   : > { %3637 = vmatprep.subr.bf16.mxu0 %v3766_v10  ;;  %2118 = vmatmul.mubr.bf16.gmra.mrb[64].mxu0 %v4383_v59  ;;  %v3784_v59 = vpack.c.bf16 %v4316_v60, %v4282_v18  ;;  %v3787_v18 = vpack.c.bf16 %v4346_v21, %v4318_v61  ;;  %v3793_v61 = vpack.c.bf16 %v4381_v23, %v4356_v4  ;;  %v2603_v23 = vld [vmem:[#allocation2 + $0x50] sm:$0xff]  ;;  %v2606_v21 = vld [vmem:[#allocation2 + $0x68] sm:$0xff] }
  0xb9   : > { %2474 = vmatmul.mubr.bf16.gmra.mrb[64].mxu1 %v4738_v48  ;;  %2125 = vmatprep.mubr.bf16.mxu0 %v4388_v63  ;;  %v5214_v63 = vld [vmem:[#allocation6_spill] sm:$0xff]  ;;  %v2628_v30 = vpack.c.bf16 %v2603_v23, %v4682_v20 }
  0xba   : > { %3782 = vmatprep.mubr.msk.bf16.mxu1 %vm4747_vm5, %v3781_v1  ;;  %3685 = vmatpush3.bf16.msra.mxu1 %v3766_v10  ;;  %v3799_v4 = vpack.c.bf16 %v5214_v63, %v5213_v24 }
  0xbb   : > { %3678 = vmatprep.subr.bf16.mxu1 %v3767_v13  ;;  %3638 = vmatpush3.bf16.msra.mxu0 %v3766_v10 }
  0xbc   : > { %3639 = vmatprep.subr.bf16.mxu0 %v3767_v13 }
  0xbe   : > { %3686 = vmatpush3.bf16.msra.mxu1 %v3767_v13 }
  0xbf   : > { %3679 = vmatprep.subr.bf16.mxu1 %v3768_v54  ;;  %3640 = vmatpush3.bf16.msra.mxu0 %v3767_v13 }
  0xc0   : > { %3641 = vmatprep.subr.bf16.mxu0 %v3768_v54  ;;  %2126 = vmatmul.mubr.bf16.gmra.mrb[68].mxu0 %v4437_v0 }
  0xc1   : > { %2482 = vmatmul.mubr.bf16.gmra.mrb[68].mxu1 %v4760_v49  ;;  %2133 = vmatprep.mubr.bf16.mxu0 %v4444_v35  ;;  %v5218_v35 = vld [vmem:[#allocation7_spill] sm:$0xff] }
  0xc2   : > { %3785 = vmatprep.mubr.msk.bf16.mxu1 %vm4769_vm6, %v3784_v59  ;;  %3687 = vmatpush3.bf16.msra.mxu1 %v3768_v54 }
  0xc3   : > { %3680 = vmatprep.subr.bf16.mxu1 %v3769_v51  ;;  %3642 = vmatpush3.bf16.msra.mxu0 %v3768_v54  ;;  %v1938_v54 = vpack.c.bf16 %v1883_v29, %v1882_v12  ;;  %v2608_v12 = vld [vmem:[#allocation2 + $0x78] sm:$0xff]  ;;  %v2609_v29 = vld [vmem:[#allocation2 + $0x80] sm:$0xff] }
  0xc4   : > { %3643 = vmatprep.subr.bf16.mxu0 %v3769_v51 }
  0xc6   : > { %3688 = vmatpush3.bf16.msra.mxu1 %v3769_v51 }
  0xc7   : > { %3644 = vmatpush3.bf16.msra.mxu0 %v3769_v51 }
  0xc8   : > { %2134 = vmatmul.mubr.bf16.gmra.mrb[72].mxu0 %v4489_v16  ;;  %v5219_v16 = vld [vmem:[#allocation8_spill] sm:$0xff] }
  0xc9   : > { %2490 = vmatmul.mubr.bf16.gmra.mrb[72].mxu1 %v4687_v27  ;;  %2141 = vmatprep.mubr.bf16.mxu0 %v4495_v56  ;;  %v3805_v56 = vpack.c.bf16 %v5219_v16, %v5218_v35  ;;  %v5233_v27 = vld [vmem:[#allocation15_spill] sm:$0xff] }
  0xca   : > { %3788 = vmatprep.mubr.msk.bf16.mxu1 %vm4783_vm7, %v3787_v18  ;;  %v4886_v53 = vpack.c.bf16 %v5234_v8, %v5233_v27 }
  0xd0   : > { %2142 = vmatmul.mubr.bf16.gmra.mrb[76].mxu0 %v4550_v43 }
  0xd1   : > { %3791 = vmatmul.mubr.msk.bf16.gmra.mrb[76].mxu1 %vm4701_vm3, %v4707_v33  ;;  %2149 = vmatprep.mubr.bf16.mxu0 %v4556_v5  ;;  %v3829_v33 = vpack.c.bf16 %v4645_v40, %v5236_v45  ;;  %v3835_v40 = vpack.c.bf16 %v4660_v6, %v4647_v50  ;;  %v2616_v6 = vld [vmem:[#allocation2 + $0xb8] sm:$0xff]  ;;  %v2607_v45 = vld [vmem:[#allocation2 + $0x70] sm:$0xff] }
  0xd2   : > { %3794 = vmatprep.mubr.msk.bf16.mxu1 %vm4799_vm8, %v3793_v61  ;;  %v3841_v57 = vpack.c.bf16 %v5214_v63, %v2616_v6 }
  0xd8   : > { %2150 = vmatmul.mubr.bf16.gmra.mrb[80].mxu0 %v4608_v2  ;;  %v5223_v2 = vld [vmem:[#allocation9_spill] sm:$0xff] }
  0xd9   : > { %3797 = vmatmul.mubr.msk.bf16.gmra.mrb[80].mxu1 %vm4725_vm4, %v3778_v11  ;;  %2157 = vmatprep.mubr.bf16.mxu0 %v4613_v38  ;;  %v5224_v38 = vld [vmem:[#allocation11_spill] sm:$0xff] }
  0xda   : > { %3800 = vmatprep.mubr.msk.bf16.mxu1 %vm4814_vm9, %v3799_v4  ;;  %v4850_v25 = vpack.c.bf16 %v5224_v38, %v5223_v2 }
  0xe0   : > { %2158 = vmatmul.mubr.bf16.gmra.mrb[84].mxu0 %v4618_v31 }
  0xe1   : > { %3803 = vmatmul.mubr.msk.bf16.gmra.mrb[84].mxu1 %vm4747_vm5, %v3781_v1  ;;  %2165 = vmatprep.mubr.bf16.mxu0 %v4621_v42 }
  0xe2   : > { %3806 = vmatprep.mubr.msk.bf16.mxu1 %vm4829_vm10, %v3805_v56 }
  0xe8   : > { %2166 = vmatmul.mubr.bf16.gmra.mrb[88].mxu0 %v4649_v62 }
  0xe9   : > { %3809 = vmatmul.mubr.msk.bf16.gmra.mrb[88].mxu1 %vm4769_vm6, %v3784_v59  ;;  %2173 = vmatprep.mubr.bf16.mxu0 %v4656_v47 }
  0xea   : > { %3812 = vmatprep.mubr.msk.bf16.mxu1 %vm4844_vm11, %v4850_v25 }
  0xf0   : > { %2174 = vmatmul.mubr.bf16.gmra.mrb[92].mxu0 %v4668_v55  ;;  %v1908_v55 = vld [vmem:[#allocation2 + $0x109] sm:$0xff] }
  0xf1   : > { %3815 = vmatmul.mubr.msk.bf16.gmra.mrb[92].mxu1 %vm4783_vm7, %v3787_v18  ;;  %2181 = vmatprep.mubr.bf16.mxu0 %v4671_v44  ;;  %v1909_v44 = vld [vmem:[#allocation2 + $0x111] sm:$0xff]  ;;  %v2618_v18 = vld [vmem:[#allocation2 + $0xc8] sm:$0xff] }
  0xf2   : > { %3818 = vmatprep.mubr.msk.bf16.mxu1 %vm4862_vm12, %v4868_v46  ;;  %v1937_v22 = vpack.c.bf16 %v1909_v44, %v1908_v55  ;;  %v2636_v0 = vpack.c.bf16 %v5219_v16, %v2618_v18  ;;  %v2604_v44 = vld [vmem:[#allocation2 + $0x58] sm:$0xff] }
  0xf8   : > { %2182 = vmatmul.mubr.bf16.gmra.mrb[96].mxu0 %v4676_v26  ;;  %v1880_v26 = vld [vmem:[#allocation2 + $0x107] sm:$0xff] }
  0xf9   : > { %3821 = vmatmul.mubr.msk.bf16.gmra.mrb[96].mxu1 %vm4799_vm8, %v3793_v61  ;;  %2189 = vmatprep.mubr.bf16.mxu0 %v4679_v32  ;;  %v1910_v32 = vld [vmem:[#allocation2 + $0x119] sm:$0xff]  ;;  %v1936_v52 = vpack.c.bf16 %v1881_v28, %v1880_v26 }
  0xfa   : > { %3824 = vmatprep.mubr.msk.bf16.mxu1 %vm4880_vm13, %v4886_v53  ;;  %v1939_v36 = vpack.c.bf16 %v1911_v19, %v1910_v32 }
 0x100   : > { %2190 = vmatmul.mubr.bf16.gmra.mrb[100].mxu0 %v4689_v7  ;;  %v2615_v7 = vld [vmem:[#allocation2 + $0xb0] sm:$0xff] }
 0x101   : > { %3827 = vmatmul.mubr.msk.bf16.gmra.mrb[100].mxu1 %vm4814_vm9, %v3799_v4  ;;  %2197 = vmatprep.mubr.bf16.mxu0 %v1937_v22  ;;  %v2634_v58 = vpack.c.bf16 %v2615_v7, %v2614_v9  ;;  %v2605_v22 = vld [vmem:[#allocation2 + $0x60] sm:$0xff] }
 0x102   : > { %3830 = vmatprep.mubr.msk.bf16.mxu1 %vm3828_vm14, %v3829_v33  ;;  %v2629_v32 = vpack.c.bf16 %v2605_v22, %v2604_v44 }
 0x108   : > { %2198 = vmatmul.mubr.bf16.gmra.mrb[104].mxu0 %v1936_v52  ;;  %v3223_v1 = vpop.f32.mrb[0].mxu0 }
 0x109   : > { %3833 = vmatmul.mubr.msk.bf16.gmra.mrb[104].mxu1 %vm4829_vm10, %v3805_v56  ;;  %2205 = vmatprep.mubr.bf16.mxu0 %v1939_v36  ;;  %v3224_v3 = vpop.f32.mrb[1].mxu0 }
 0x10a   : > { %3836 = vmatprep.mubr.msk.bf16.mxu1 %vm3834_vm15, %v3835_v40  ;;  %v3225_v51 = vadd.f32 %v3224_v3, %v3223_v1  ;;  %v3226_v17 = vpop.f32.mrb[2].mxu0 }
 0x10b   : > { %v3227_v50 = vpop.f32.mrb[3].mxu0 }
 0x10c   : > { %v3323_v14 = vpop.f32.mrb[0].mxu1  ;;  %v3228_v39 = vadd.f32 %v3227_v50, %v3226_v17 }
 0x10d   : > { %v3324_v11 = vpop.f32.mrb[1].mxu1 }
 0x10e   : > { %v3325_v10 = vadd.f32 %v3324_v11, %v3323_v14  ;;  %v3326_v13 = vpop.f32.mrb[2].mxu1 }
 0x10f   : > { %v3327_v37 = vpop.f32.mrb[3].mxu1 }
 0x110   : > { %v3328_v41 = vadd.f32 %v3327_v37, %v3326_v13  ;;  %v4911_v59 = vadd.f32 %v3325_v10, %v3225_v51  ;;  %2206 = vmatmul.mubr.bf16.gmra.mrb[108].mxu0 %v1938_v54  ;;  %v2611_v13 = vld [vmem:[#allocation2 + $0x90] sm:$0xff] }
 0x111   : > { %3839 = vmatmul.mubr.msk.bf16.gmra.mrb[108].mxu1 %vm4844_vm11, %v4850_v25  ;;  %3645 = vmatprep.mubr.bf16.mxu0 %v4738_v48 }
 0x112   : > { %3661 = vmatprep.mubr.bf16.mxu1 %v2634_v58  ;;  %v4913_v61 = vadd.f32 %v3328_v41, %v3228_v39 }
 0x113   : > { %v3229_v35 = vpop.f32.mrb[4].mxu0 }
 0x114   : > { %v3329_v60 = vpop.f32.mrb[4].mxu1  ;;  %v3230_v43 = vpop.f32.mrb[5].mxu0 }
 0x115   : > { %v3330_v15 = vpop.f32.mrb[5].mxu1  ;;  %v3231_v38 = vadd.f32 %v3230_v43, %v3229_v35  ;;  %v3232_v31 = vpop.f32.mrb[6].mxu0 }
 0x116   : > { %v3331_v24 = vadd.f32 %v3330_v15, %v3329_v60  ;;  %v3332_v4 = vpop.f32.mrb[6].mxu1  ;;  %v3233_v62 = vpop.f32.mrb[7].mxu0  ;;  %v2612_v60 = vld [vmem:[#allocation2 + $0x98] sm:$0xff]  ;;  %v2613_v15 = vld [vmem:[#allocation2 + $0xa0] sm:$0xff] }
 0x117   : > { %v3333_v56 = vpop.f32.mrb[7].mxu1  ;;  %v3234_v27 = vadd.f32 %v3233_v62, %v3232_v31 }
 0x118   : > { %v3334_v2 = vadd.f32 %v3333_v56, %v3332_v4  ;;  %v4921_v48 = vadd.f32 %v3331_v24, %v3231_v38  ;;  %3646 = vmatmul.mubr.bf16.vlgmr.msra.gmra.mrb[112].mxu0 %v4760_v49  ;;  %v2630_v49 = vpack.c.bf16 %v2607_v45, %v2606_v21 }
 0x119   : > { %3842 = vmatmul.mubr.msk.bf16.vlgmr.msra.gmra.mrb[112].mxu1 %vm4814_vm9, %v3841_v57  ;;  %3649 = vmatprep.mubr.bf16.mxu0 %v2628_v30 }
 0x11a   : > { %3665 = vmatprep.mubr.bf16.mxu1 %v2636_v0  ;;  %v4924_v8 = vadd.f32 %v3334_v2, %v3234_v27 }
 0x11b   : > { %v3235_v33 = vpop.f32.mrb[8].mxu0 }
 0x11c   : > { %v3335_v16 = vpop.f32.mrb[8].mxu1  ;;  %v3236_v26 = vpop.f32.mrb[9].mxu0 }
 0x11d   : > { %v3336_v55 = vpop.f32.mrb[9].mxu1  ;;  %v3237_v19 = vadd.f32 %v3236_v26, %v3235_v33  ;;  %v3238_v52 = vpop.f32.mrb[10].mxu0 }
 0x11e   : > { %v3337_v63 = vadd.f32 %v3336_v55, %v3335_v16  ;;  %v3338_v34 = vpop.f32.mrb[10].mxu1  ;;  %v3239_v36 = vpop.f32.mrb[11].mxu0 }
 0x11f   : > { %v3339_v20 = vpop.f32.mrb[11].mxu1  ;;  %v3240_v9 = vadd.f32 %v3239_v36, %v3238_v52 }
 0x120   : > { %v3340_v28 = vadd.f32 %v3339_v20, %v3338_v34  ;;  %v4932_v40 = vadd.f32 %v3337_v63, %v3237_v19  ;;  %3650 = vmatmul.mubr.bf16.gmra.mrb[116].mxu0 %v2629_v32 }
 0x121   : > { %3845 = vmatmul.mubr.msk.bf16.gmra.mrb[116].mxu1 %vm4844_vm11, %v4850_v25  ;;  %3653 = vmatprep.mubr.bf16.mxu0 %v2630_v49  ;;  %v2610_v25 = vld [vmem:[#allocation2 + $0x88] sm:$0xff] }
 0x122   : > { %3848 = vmatprep.mubr.msk.bf16.mxu1 %vm4862_vm12, %v4868_v46  ;;  %v4934_v14 = vadd.f32 %v3340_v28, %v3240_v9  ;;  %v2631_v46 = vpack.c.bf16 %v2609_v29, %v2608_v12  ;;  %v2632_v54 = vpack.c.bf16 %v2611_v13, %v2610_v25 }
 0x123   : > { %v3241_v58 = vpop.f32.mrb[12].mxu0 }
 0x124   : > { %v3341_v7 = vpop.f32.mrb[12].mxu1  ;;  %v3242_v37 = vpop.f32.mrb[13].mxu0 }
 0x125   : > { %v3342_v11 = vpop.f32.mrb[13].mxu1  ;;  %v3243_v3 = vadd.f32 %v3242_v37, %v3241_v58  ;;  %v3244_v41 = vpop.f32.mrb[14].mxu0 }
 0x126   : > { %v3343_v10 = vadd.f32 %v3342_v11, %v3341_v7  ;;  %v3344_v5 = vpop.f32.mrb[14].mxu1  ;;  %v3245_v51 = vpop.f32.mrb[15].mxu0 }
 0x127   : > { %v3345_v1 = vpop.f32.mrb[15].mxu1  ;;  %v3246_v50 = vadd.f32 %v3245_v51, %v3244_v41 }
 0x128   : > { %v3346_v42 = vadd.f32 %v3345_v1, %v3344_v5  ;;  %v4939_v17 = vadd.f32 %v3343_v10, %v3243_v3  ;;  %3654 = vmatmul.mubr.bf16.gmra.mrb[120].mxu0 %v2631_v46 }
 0x129   : > { %3851 = vmatmul.mubr.msk.bf16.gmra.mrb[120].mxu1 %vm4880_vm13, %v4886_v53  ;;  %3657 = vmatprep.mubr.bf16.mxu0 %v2632_v54  ;;  %v2633_v53 = vpack.c.bf16 %v2613_v15, %v2612_v60 }
 0x12a   : > { %v4941_v39 = vadd.f32 %v3346_v42, %v3246_v50 }
 0x12b   : > { %v3247_v23 = vpop.f32.mrb[16].mxu0 }
 0x12c   : > { %v3347_v6 = vpop.f32.mrb[16].mxu1  ;;  %v3248_v35 = vpop.f32.mrb[17].mxu0 }
 0x12d   : > { %v3348_v18 = vpop.f32.mrb[17].mxu1  ;;  %v3249_v56 = vadd.f32 %v3248_v35, %v3247_v23  ;;  %v3250_v43 = vpop.f32.mrb[18].mxu0 }
 0x12e   : > { %v3349_v24 = vadd.f32 %v3348_v18, %v3347_v6  ;;  %v3350_v4 = vpop.f32.mrb[18].mxu1  ;;  %v3251_v2 = vpop.f32.mrb[19].mxu0 }
 0x12f   : > { %v3351_v0 = vpop.f32.mrb[19].mxu1  ;;  %v3252_v31 = vadd.f32 %v3251_v2, %v3250_v43 }
 0x130   : > { %v3352_v47 = vadd.f32 %v3351_v0, %v3350_v4  ;;  %v4943_v38 = vadd.f32 %v3349_v24, %v3249_v56  ;;  %3658 = vmatmul.mubr.bf16.gmra.mrb[124].mxu0 %v2633_v53 }
 0x132   : > { %v4945_v30 = vadd.f32 %v3352_v47, %v3252_v31 }
 0x133   : > { %v3253_v55 = vpop.f32.mrb[20].mxu0 }
 0x134   : > { %v3353_v57 = vpop.f32.mrb[20].mxu1  ;;  %v3254_v22 = vpop.f32.mrb[21].mxu0 }
 0x135   : > { %v3354_v62 = vpop.f32.mrb[21].mxu1  ;;  %v3255_v34 = vadd.f32 %v3254_v22, %v3253_v55  ;;  %v3256_v21 = vpop.f32.mrb[22].mxu0 }
 0x136   : > { %v3355_v27 = vadd.f32 %v3354_v62, %v3353_v57  ;;  %v3356_v16 = vpop.f32.mrb[22].mxu1  ;;  %v3257_v45 = vpop.f32.mrb[23].mxu0 }
 0x137   : > { %v3357_v44 = vpop.f32.mrb[23].mxu1  ;;  %v3258_v20 = vadd.f32 %v3257_v45, %v3256_v21 }
 0x138   : > { %v3358_v63 = vadd.f32 %v3357_v44, %v3356_v16  ;;  %v4947_v33 = vadd.f32 %v3355_v27, %v3255_v34 }
 0x13a   : > { %v4949_v28 = vadd.f32 %v3358_v63, %v3258_v20 }
 0x13b   : > { %v3259_v49 = vpop.f32.mrb[24].mxu0 }
 0x13c   : > { %v3359_v26 = vpop.f32.mrb[24].mxu1  ;;  %v3260_v9 = vpop.f32.mrb[25].mxu0 }
 0x13d   : > { %v3360_v32 = vpop.f32.mrb[25].mxu1  ;;  %v3261_v11 = vadd.f32 %v3260_v9, %v3259_v49  ;;  %v3262_v12 = vpop.f32.mrb[26].mxu0 }
 0x13e   : > { %v3361_v19 = vadd.f32 %v3360_v32, %v3359_v26  ;;  %v3362_v52 = vpop.f32.mrb[26].mxu1  ;;  %v3263_v29 = vpop.f32.mrb[27].mxu0 }
 0x13f   : > { %v3363_v36 = vpop.f32.mrb[27].mxu1  ;;  %v3264_v5 = vadd.f32 %v3263_v29, %v3262_v12 }
 0x140   : > { %v3364_v7 = vadd.f32 %v3363_v36, %v3362_v52  ;;  %v4951_v10 = vadd.f32 %v3361_v19, %v3261_v11 }
 0x142   : > { %v4953_v13 = vadd.f32 %v3364_v7, %v3264_v5 }
 0x143   : > { %v3265_v42 = vpop.f32.mrb[28].mxu0 }
 0x144   : > { %v3365_v25 = vpop.f32.mrb[28].mxu1  ;;  %v3266_v3 = vpop.f32.mrb[29].mxu0 }
 0x145   : > { %v3366_v58 = vpop.f32.mrb[29].mxu1  ;;  %v3267_v54 = vadd.f32 %v3266_v3, %v3265_v42  ;;  %v3268_v51 = vpop.f32.mrb[30].mxu0 }
 0x146   : > { %v3367_v1 = vadd.f32 %v3366_v58, %v3365_v25  ;;  %v3368_v37 = vpop.f32.mrb[30].mxu1  ;;  %v3269_v50 = vpop.f32.mrb[31].mxu0 }
 0x147   : > { %v3369_v46 = vpop.f32.mrb[31].mxu1  ;;  %v3270_v18 = vadd.f32 %v3269_v50, %v3268_v51 }
 0x148   : > { %v3370_v41 = vadd.f32 %v3369_v46, %v3368_v37  ;;  %v4955_v6 = vadd.f32 %v3367_v1, %v3267_v54 }
 0x14a   : > { %v4957_v15 = vadd.f32 %v3370_v41, %v3270_v18 }
 0x14b   : > { %v3271_v0 = vpop.f32.mrb[32].mxu0 }
 0x14c   : > { %v3371_v60 = vpop.f32.mrb[32].mxu1  ;;  %v3272_v47 = vpop.f32.mrb[33].mxu0 }
 0x14d   : > { %v3372_v24 = vpop.f32.mrb[33].mxu1  ;;  %v3273_v56 = vadd.f32 %v3272_v47, %v3271_v0  ;;  %v3274_v43 = vpop.f32.mrb[34].mxu0 }
 0x14e   : > { %v3373_v4 = vadd.f32 %v3372_v24, %v3371_v60  ;;  %v3374_v23 = vpop.f32.mrb[34].mxu1  ;;  %v3275_v2 = vpop.f32.mrb[35].mxu0 }
 0x14f   : > { %v3375_v35 = vpop.f32.mrb[35].mxu1  ;;  %v3276_v57 = vadd.f32 %v3275_v2, %v3274_v43 }
 0x150   : > { %v3376_v53 = vadd.f32 %v3375_v35, %v3374_v23  ;;  %v4959_v31 = vadd.f32 %v3373_v4, %v3273_v56 }
 0x152   : > { %v4961_v27 = vadd.f32 %v3376_v53, %v3276_v57 }
 0x153   : > { %v3277_v22 = vpop.f32.mrb[36].mxu0 }
 0x154   : > { %v3377_v62 = vpop.f32.mrb[36].mxu1  ;;  %v3278_v34 = vpop.f32.mrb[37].mxu0 }
 0x155   : > { %v3378_v16 = vpop.f32.mrb[37].mxu1  ;;  %v3279_v45 = vadd.f32 %v3278_v34, %v3277_v22  ;;  %v3280_v20 = vpop.f32.mrb[38].mxu0 }
 0x156   : > { %v3379_v55 = vadd.f32 %v3378_v16, %v3377_v62  ;;  %v3380_v44 = vpop.f32.mrb[38].mxu1  ;;  %v3281_v26 = vpop.f32.mrb[39].mxu0 }
 0x157   : > { %v3381_v63 = vpop.f32.mrb[39].mxu1  ;;  %v3282_v19 = vadd.f32 %v3281_v26, %v3280_v20 }
 0x158   : > { %v3382_v21 = vadd.f32 %v3381_v63, %v3380_v44  ;;  %v4963_v32 = vadd.f32 %v3379_v55, %v3279_v45 }
 0x15a   : > { %v4965_v49 = vadd.f32 %v3382_v21, %v3282_v19 }
 0x15b   : > { %v3283_v11 = vpop.f32.mrb[40].mxu0 }
 0x15c   : > { %v3383_v52 = vpop.f32.mrb[40].mxu1  ;;  %v3284_v29 = vpop.f32.mrb[41].mxu0 }
 0x15d   : > { %v3384_v36 = vpop.f32.mrb[41].mxu1  ;;  %v3285_v25 = vadd.f32 %v3284_v29, %v3283_v11  ;;  %v3286_v58 = vpop.f32.mrb[42].mxu0 }
 0x15e   : > { %v3385_v9 = vadd.f32 %v3384_v36, %v3383_v52  ;;  %v3386_v7 = vpop.f32.mrb[42].mxu1  ;;  %v3287_v1 = vpop.f32.mrb[43].mxu0 }
 0x15f   : > { %v3387_v12 = vpop.f32.mrb[43].mxu1  ;;  %v3288_v42 = vadd.f32 %v3287_v1, %v3286_v58 }
 0x160   : > { %v3388_v5 = vadd.f32 %v3387_v12, %v3386_v7  ;;  %v4967_v37 = vadd.f32 %v3385_v9, %v3285_v25 }
 0x162   : > { %v4969_v3 = vadd.f32 %v3388_v5, %v3288_v42 }
 0x163   : > { %v3289_v50 = vpop.f32.mrb[44].mxu0 }
 0x164   : > { %v3389_v46 = vpop.f32.mrb[44].mxu1  ;;  %v3290_v60 = vpop.f32.mrb[45].mxu0 }
 0x165   : > { %v3390_v41 = vpop.f32.mrb[45].mxu1  ;;  %v3291_v4 = vadd.f32 %v3290_v60, %v3289_v50  ;;  %v3292_v23 = vpop.f32.mrb[46].mxu0 }
 0x166   : > { %v3391_v54 = vadd.f32 %v3390_v41, %v3389_v46  ;;  %v3392_v51 = vpop.f32.mrb[46].mxu1  ;;  %v3293_v0 = vpop.f32.mrb[47].mxu0 }
 0x167   : > { %v3393_v18 = vpop.f32.mrb[47].mxu1  ;;  %v3294_v47 = vadd.f32 %v3293_v0, %v3292_v23 }
 0x168   : > { %v3394_v24 = vadd.f32 %v3393_v18, %v3392_v51  ;;  %v4971_v35 = vadd.f32 %v3391_v54, %v3291_v4 }
 0x16a   : > { %v4973_v56 = vadd.f32 %v3394_v24, %v3294_v47 }
 0x16b   : > { %v3295_v62 = vpop.f32.mrb[48].mxu0 }
 0x16c   : > { %v3395_v53 = vpop.f32.mrb[48].mxu1  ;;  %v3296_v55 = vpop.f32.mrb[49].mxu0 }
 0x16d   : > { %v3396_v43 = vpop.f32.mrb[49].mxu1  ;;  %v3297_v22 = vadd.f32 %v3296_v55, %v3295_v62  ;;  %v3298_v63 = vpop.f32.mrb[50].mxu0 }
 0x16e   : > { %v3397_v2 = vadd.f32 %v3396_v43, %v3395_v53  ;;  %v3398_v57 = vpop.f32.mrb[50].mxu1  ;;  %v3299_v34 = vpop.f32.mrb[51].mxu0 }
 0x16f   : > { %v3399_v16 = vpop.f32.mrb[51].mxu1  ;;  %v3300_v45 = vadd.f32 %v3299_v34, %v3298_v63 }
 0x170   : > { %v3400_v44 = vadd.f32 %v3399_v16, %v3398_v57  ;;  %v4975_v21 = vadd.f32 %v3397_v2, %v3297_v22 }
 0x172   : > { %v4977_v26 = vadd.f32 %v3400_v44, %v3300_v45 }
 0x173   : > { %v3301_v9 = vpop.f32.mrb[52].mxu0 }
 0x174   : > { %v3401_v20 = vpop.f32.mrb[52].mxu1  ;;  %v3302_v11 = vpop.f32.mrb[53].mxu0 }
 0x175   : > { %v3402_v19 = vpop.f32.mrb[53].mxu1  ;;  %v3303_v29 = vadd.f32 %v3302_v11, %v3301_v9  ;;  %v3304_v5 = vpop.f32.mrb[54].mxu0 }
 0x176   : > { %v3403_v52 = vadd.f32 %v3402_v19, %v3401_v20  ;;  %v3404_v36 = vpop.f32.mrb[54].mxu1  ;;  %v3305_v25 = vpop.f32.mrb[55].mxu0 }
 0x177   : > { %v3405_v7 = vpop.f32.mrb[55].mxu1  ;;  %v3306_v1 = vadd.f32 %v3305_v25, %v3304_v5 }
 0x178   : > { %v3406_v12 = vadd.f32 %v3405_v7, %v3404_v36  ;;  %v4979_v58 = vadd.f32 %v3403_v52, %v3303_v29 }
 0x17a   : > { %v4981_v46 = vadd.f32 %v3406_v12, %v3306_v1 }
 0x17b   : > { %v3423_v50 = vpop.f32.mrb[56].mxu0 }
 0x17c   : > { %v3523_v42 = vpop.f32.mrb[56].mxu1  ;;  %v3424_v60 = vpop.f32.mrb[57].mxu0 }
 0x17d   : > { %v3524_v41 = vpop.f32.mrb[57].mxu1  ;;  %v3425_v4 = vadd.f32 %v3424_v60, %v3423_v50  ;;  %v3426_v23 = vpop.f32.mrb[58].mxu0 }
 0x17e   : > { %v3525_v54 = vadd.f32 %v3524_v41, %v3523_v42  ;;  %v3526_v51 = vpop.f32.mrb[58].mxu1  ;;  %v3427_v0 = vpop.f32.mrb[59].mxu0 }
 0x17f   : > { %v3527_v18 = vpop.f32.mrb[59].mxu1  ;;  %v2214_v47 = vadd.f32 %v3425_v4, %v4911_v59  ;;  %v3428_v53 = vadd.f32 %v3427_v0, %v3426_v23 }
 0x180   : > { %v3528_v24 = vadd.f32 %v3527_v18, %v3526_v51 }
 0x181   : > { %v2215_v2 = vadd.f32 %v3428_v53, %v4913_v61  ;;  %v4985_v62 = vadd.f32 %v3525_v54, %v2214_v47 }
 0x183   : > { %v3429_v44 = vpop.f32.mrb[60].mxu0  ;;  %v4987_v63 = vadd.f32 %v3528_v24, %v2215_v2 }
 0x184   : > { %v3529_v43 = vpop.f32.mrb[60].mxu1  ;;  %v3430_v34 = vpop.f32.mrb[61].mxu0 }
 0x185   : > { %v3530_v57 = vpop.f32.mrb[61].mxu1  ;;  %v3431_v20 = vadd.f32 %v3430_v34, %v3429_v44  ;;  %v3432_v19 = vpop.f32.mrb[62].mxu0 }
 0x186   : > { %v3531_v16 = vadd.f32 %v3530_v57, %v3529_v43  ;;  %v3532_v55 = vpop.f32.mrb[62].mxu1  ;;  %v3433_v52 = vpop.f32.mrb[63].mxu0 }
 0x187   : > { %v3533_v22 = vpop.f32.mrb[63].mxu1  ;;  %v2216_v59 = vadd.f32 %v3431_v20, %v4921_v48  ;;  %v3434_v36 = vadd.f32 %v3433_v52, %v3432_v19 }
 0x188   : > { %v3534_v45 = vadd.f32 %v3533_v22, %v3532_v55 }
 0x189   : > { %v2217_v61 = vadd.f32 %v3434_v36, %v4924_v8  ;;  %v4991_v11 = vadd.f32 %v3531_v16, %v2216_v59 }
 0x18b   : > { %v3435_v5 = vpop.f32.mrb[64].mxu0  ;;  %v4993_v1 = vadd.f32 %v3534_v45, %v2217_v61 }
 0x18c   : > { %v3535_v9 = vpop.f32.mrb[64].mxu1  ;;  %v3436_v42 = vpop.f32.mrb[65].mxu0 }
 0x18d   : > { %v3536_v7 = vpop.f32.mrb[65].mxu1  ;;  %v3437_v54 = vadd.f32 %v3436_v42, %v3435_v5  ;;  %v3438_v51 = vpop.f32.mrb[66].mxu0 }
 0x18e   : > { %v3537_v12 = vadd.f32 %v3536_v7, %v3535_v9  ;;  %v3538_v29 = vpop.f32.mrb[66].mxu1  ;;  %v3439_v50 = vpop.f32.mrb[67].mxu0 }
 0x18f   : > { %v3539_v25 = vpop.f32.mrb[67].mxu1  ;;  %v2218_v48 = vadd.f32 %v3437_v54, %v4932_v40  ;;  %v3440_v18 = vadd.f32 %v3439_v50, %v3438_v51 }
 0x190   : > { %v3540_v41 = vadd.f32 %v3539_v25, %v3538_v29 }
 0x191   : > { %v2219_v8 = vadd.f32 %v3440_v18, %v4934_v14  ;;  %v4997_v4 = vadd.f32 %v3537_v12, %v2218_v48 }
 0x193   : > { %v3441_v47 = vpop.f32.mrb[68].mxu0  ;;  %v4999_v43 = vadd.f32 %v3540_v41, %v2219_v8 }
 0x194   : > { %v3541_v60 = vpop.f32.mrb[68].mxu1  ;;  %v3442_v2 = vpop.f32.mrb[69].mxu0 }
 0x195   : > { %v3542_v24 = vpop.f32.mrb[69].mxu1  ;;  %v3443_v16 = vadd.f32 %v3442_v2, %v3441_v47  ;;  %v3444_v55 = vpop.f32.mrb[70].mxu0 }
 0x196   : > { %v3543_v23 = vadd.f32 %v3542_v24, %v3541_v60  ;;  %v3544_v0 = vpop.f32.mrb[70].mxu1  ;;  %v3445_v44 = vpop.f32.mrb[71].mxu0 }
 0x197   : > { %v3545_v53 = vpop.f32.mrb[71].mxu1  ;;  %v2220_v40 = vadd.f32 %v3443_v16, %v4939_v17  ;;  %v3446_v22 = vadd.f32 %v3445_v44, %v3444_v55 }
 0x198   : > { %v3546_v57 = vadd.f32 %v3545_v53, %v3544_v0 }
 0x199   : > { %v2221_v14 = vadd.f32 %v3446_v22, %v4941_v39  ;;  %v5003_v20 = vadd.f32 %v3543_v23, %v2220_v40 }
 0x19b   : > { %v3447_v59 = vpop.f32.mrb[72].mxu0  ;;  %v5005_v9 = vadd.f32 %v3546_v57, %v2221_v14 }
 0x19c   : > { %v3547_v34 = vpop.f32.mrb[72].mxu1  ;;  %v3448_v61 = vpop.f32.mrb[73].mxu0 }
 0x19d   : > { %v3548_v45 = vpop.f32.mrb[73].mxu1  ;;  %v3449_v12 = vadd.f32 %v3448_v61, %v3447_v59  ;;  %v3450_v29 = vpop.f32.mrb[74].mxu0 }
 0x19e   : > { %v3549_v19 = vadd.f32 %v3548_v45, %v3547_v34  ;;  %v3550_v52 = vpop.f32.mrb[74].mxu1  ;;  %v3451_v5 = vpop.f32.mrb[75].mxu0 }
 0x19f   : > { %v3551_v36 = vpop.f32.mrb[75].mxu1  ;;  %v2222_v17 = vadd.f32 %v3449_v12, %v4943_v38  ;;  %v3452_v25 = vadd.f32 %v3451_v5, %v3450_v29 }
 0x1a0   : > { %v3552_v7 = vadd.f32 %v3551_v36, %v3550_v52 }
 0x1a1   : > { %v2223_v39 = vadd.f32 %v3452_v25, %v4945_v30  ;;  %v5009_v54 = vadd.f32 %v3549_v19, %v2222_v17 }
 0x1a3   : > { %v3453_v48 = vpop.f32.mrb[76].mxu0  ;;  %v5011_v60 = vadd.f32 %v3552_v7, %v2223_v39 }
 0x1a4   : > { %v3553_v42 = vpop.f32.mrb[76].mxu1  ;;  %v3454_v8 = vpop.f32.mrb[77].mxu0 }
 0x1a5   : > { %v3554_v41 = vpop.f32.mrb[77].mxu1  ;;  %v3455_v23 = vadd.f32 %v3454_v8, %v3453_v48  ;;  %v3456_v0 = vpop.f32.mrb[78].mxu0 }
 0x1a6   : > { %v3555_v51 = vadd.f32 %v3554_v41, %v3553_v42  ;;  %v3556_v50 = vpop.f32.mrb[78].mxu1  ;;  %v3457_v47 = vpop.f32.mrb[79].mxu0 }
 0x1a7   : > { %v3557_v18 = vpop.f32.mrb[79].mxu1  ;;  %v2224_v38 = vadd.f32 %v3455_v23, %v4947_v33  ;;  %v3458_v53 = vadd.f32 %v3457_v47, %v3456_v0 }
 0x1a8   : > { %v3558_v24 = vadd.f32 %v3557_v18, %v3556_v50 }
 0x1a9   : > { %v2225_v30 = vadd.f32 %v3458_v53, %v4949_v28  ;;  %v5015_v16 = vadd.f32 %v3555_v51, %v2224_v38 }
 0x1ab   : > { %v3459_v40 = vpop.f32.mrb[80].mxu0  ;;  %v5017_v34 = vadd.f32 %v3558_v24, %v2225_v30 }
 0x1ac   : > { %v3559_v2 = vpop.f32.mrb[80].mxu1  ;;  %v3460_v14 = vpop.f32.mrb[81].mxu0 }
 0x1ad   : > { %v3560_v57 = vpop.f32.mrb[81].mxu1  ;;  %v3461_v19 = vadd.f32 %v3460_v14, %v3459_v40  ;;  %v3462_v52 = vpop.f32.mrb[82].mxu0 }
 0x1ae   : > { %v3561_v55 = vadd.f32 %v3560_v57, %v3559_v2  ;;  %v3562_v44 = vpop.f32.mrb[82].mxu1  ;;  %v3463_v59 = vpop.f32.mrb[83].mxu0 }
 0x1af   : > { %v3563_v22 = vpop.f32.mrb[83].mxu1  ;;  %v2226_v33 = vadd.f32 %v3461_v19, %v4951_v10  ;;  %v3464_v36 = vadd.f32 %v3463_v59, %v3462_v52 }
 0x1b0   : > { %v3564_v45 = vadd.f32 %v3563_v22, %v3562_v44 }
 0x1b1   : > { %v2227_v28 = vadd.f32 %v3464_v36, %v4953_v13  ;;  %v5021_v12 = vadd.f32 %v3561_v55, %v2226_v33 }
 0x1b3   : > { %v3465_v17 = vpop.f32.mrb[84].mxu0  ;;  %v5023_v42 = vadd.f32 %v3564_v45, %v2227_v28 }
 0x1b4   : > { %v3565_v61 = vpop.f32.mrb[84].mxu1  ;;  %v3466_v39 = vpop.f32.mrb[85].mxu0 }
 0x1b5   : > { %v3566_v7 = vpop.f32.mrb[85].mxu1  ;;  %v3467_v51 = vadd.f32 %v3466_v39, %v3465_v17  ;;  %v3468_v50 = vpop.f32.mrb[86].mxu0 }
 0x1b6   : > { %v3567_v29 = vadd.f32 %v3566_v7, %v3565_v61  ;;  %v3568_v5 = vpop.f32.mrb[86].mxu1  ;;  %v3469_v48 = vpop.f32.mrb[87].mxu0 }
 0x1b7   : > { %v3569_v25 = vpop.f32.mrb[87].mxu1  ;;  %v2228_v10 = vadd.f32 %v3467_v51, %v4955_v6  ;;  %v3470_v18 = vadd.f32 %v3469_v48, %v3468_v50 }
 0x1b8   : > { %v3570_v41 = vadd.f32 %v3569_v25, %v3568_v5 }
 0x1b9   : > { %v2229_v13 = vadd.f32 %v3470_v18, %v4957_v15  ;;  %v5027_v23 = vadd.f32 %v3567_v29, %v2228_v10 }
 0x1bb   : > { %v3471_v38 = vpop.f32.mrb[88].mxu0  ;;  %v5029_v2 = vadd.f32 %v3570_v41, %v2229_v13 }
 0x1bc   : > { %v3571_v8 = vpop.f32.mrb[88].mxu1  ;;  %v3472_v30 = vpop.f32.mrb[89].mxu0 }
 0x1bd   : > { %v3572_v24 = vpop.f32.mrb[89].mxu1  ;;  %v3473_v55 = vadd.f32 %v3472_v30, %v3471_v38  ;;  %v3474_v44 = vpop.f32.mrb[90].mxu0 }
 0x1be   : > { %v3573_v0 = vadd.f32 %v3572_v24, %v3571_v8  ;;  %v3574_v47 = vpop.f32.mrb[90].mxu1  ;;  %v3475_v40 = vpop.f32.mrb[91].mxu0 }
 0x1bf   : > { %v3575_v53 = vpop.f32.mrb[91].mxu1  ;;  %v2230_v6 = vadd.f32 %v3473_v55, %v4959_v31  ;;  %v3476_v22 = vadd.f32 %v3475_v40, %v3474_v44 }
 0x1c0   : > { %v3576_v57 = vadd.f32 %v3575_v53, %v3574_v47 }
 0x1c1   : > { %v2231_v15 = vadd.f32 %v3476_v22, %v4961_v27  ;;  %v5033_v19 = vadd.f32 %v3573_v0, %v2230_v6 }
 0x1c3   : > { %v3477_v33 = vpop.f32.mrb[92].mxu0  ;;  %v5035_v61 = vadd.f32 %v3576_v57, %v2231_v15 }
 0x1c4   : > { %v3577_v14 = vpop.f32.mrb[92].mxu1  ;;  %v3478_v28 = vpop.f32.mrb[93].mxu0 }
 0x1c5   : > { %v3578_v45 = vpop.f32.mrb[93].mxu1  ;;  %v3479_v29 = vadd.f32 %v3478_v28, %v3477_v33  ;;  %v3480_v5 = vpop.f32.mrb[94].mxu0 }
 0x1c6   : > { %v3579_v52 = vadd.f32 %v3578_v45, %v3577_v14  ;;  %v3580_v59 = vpop.f32.mrb[94].mxu1  ;;  %v3481_v17 = vpop.f32.mrb[95].mxu0 }
 0x1c7   : > { %v3581_v36 = vpop.f32.mrb[95].mxu1  ;;  %v2232_v31 = vadd.f32 %v3479_v29, %v4963_v32  ;;  %v3482_v25 = vadd.f32 %v3481_v17, %v3480_v5 }
 0x1c8   : > { %v3582_v7 = vadd.f32 %v3581_v36, %v3580_v59 }
 0x1c9   : > { %v2233_v27 = vadd.f32 %v3482_v25, %v4965_v49  ;;  %v5039_v51 = vadd.f32 %v3579_v52, %v2232_v31 }
 0x1cb   : > { %v3483_v10 = vpop.f32.mrb[96].mxu0  ;;  %v5041_v8 = vadd.f32 %v3582_v7, %v2233_v27 }
 0x1cc   : > { %v3583_v39 = vpop.f32.mrb[96].mxu1  ;;  %v3484_v13 = vpop.f32.mrb[97].mxu0 }
 0x1cd   : > { %v3584_v41 = vpop.f32.mrb[97].mxu1  ;;  %v3485_v0 = vadd.f32 %v3484_v13, %v3483_v10  ;;  %v3486_v47 = vpop.f32.mrb[98].mxu0 }
 0x1ce   : > { %v3585_v50 = vadd.f32 %v3584_v41, %v3583_v39  ;;  %v3586_v48 = vpop.f32.mrb[98].mxu1  ;;  %v3487_v38 = vpop.f32.mrb[99].mxu0 }
 0x1cf   : > { %v3587_v18 = vpop.f32.mrb[99].mxu1  ;;  %v2234_v32 = vadd.f32 %v3485_v0, %v4967_v37  ;;  %v3488_v53 = vadd.f32 %v3487_v38, %v3486_v47 }
 0x1d0   : > { %v3588_v24 = vadd.f32 %v3587_v18, %v3586_v48 }
 0x1d1   : > { %v2235_v49 = vadd.f32 %v3488_v53, %v4969_v3  ;;  %v5045_v55 = vadd.f32 %v3585_v50, %v2234_v32 }
 0x1d3   : > { %v3489_v6 = vpop.f32.mrb[100].mxu0  ;;  %v5047_v14 = vadd.f32 %v3588_v24, %v2235_v49 }
 0x1d4   : > { %v3589_v30 = vpop.f32.mrb[100].mxu1  ;;  %v3490_v15 = vpop.f32.mrb[101].mxu0 }
 0x1d5   : > { %v3590_v57 = vpop.f32.mrb[101].mxu1  ;;  %v3491_v52 = vadd.f32 %v3490_v15, %v3489_v6  ;;  %v3492_v59 = vpop.f32.mrb[102].mxu0 }
 0x1d6   : > { %v3591_v44 = vadd.f32 %v3590_v57, %v3589_v30  ;;  %v3592_v40 = vpop.f32.mrb[102].mxu1  ;;  %v3493_v33 = vpop.f32.mrb[103].mxu0 }
 0x1d7   : > { %v3593_v22 = vpop.f32.mrb[103].mxu1  ;;  %v2236_v37 = vadd.f32 %v3491_v52, %v4971_v35  ;;  %v3494_v36 = vadd.f32 %v3493_v33, %v3492_v59 }
 0x1d8   : > { %v3594_v45 = vadd.f32 %v3593_v22, %v3592_v40 }
 0x1d9   : > { %v2237_v3 = vadd.f32 %v3494_v36, %v4973_v56  ;;  %v2592_v29 = vadd.f32 %v3591_v44, %v2236_v37 }
 0x1db   : > { %v3495_v31 = vpop.f32.mrb[104].mxu0  ;;  %v2593_v39 = vadd.f32 %v3594_v45, %v2237_v3 }
 0x1dc   : > { %v3595_v28 = vpop.f32.mrb[104].mxu1  ;;  %v3496_v27 = vpop.f32.mrb[105].mxu0 }
 0x1dd   : > { %v3596_v7 = vpop.f32.mrb[105].mxu1  ;;  %v3497_v50 = vadd.f32 %v3496_v27, %v3495_v31  ;;  %v3498_v48 = vpop.f32.mrb[106].mxu0 }
 0x1de   : > { %v3597_v5 = vadd.f32 %v3596_v7, %v3595_v28  ;;  %v3598_v17 = vpop.f32.mrb[106].mxu1  ;;  %v3499_v10 = vpop.f32.mrb[107].mxu0 }
 0x1df   : > { %v3599_v25 = vpop.f32.mrb[107].mxu1  ;;  %v2238_v35 = vadd.f32 %v3497_v50, %v4975_v21  ;;  %v3500_v18 = vadd.f32 %v3499_v10, %v3498_v48 }
 0x1e0   : > { %v3600_v41 = vadd.f32 %v3599_v25, %v3598_v17 }
 0x1e1   : > { %v2239_v56 = vadd.f32 %v3500_v18, %v4977_v26  ;;  %v5055_v0 = vadd.f32 %v3597_v5, %v2238_v35 }
 0x1e3   : > { %v3501_v32 = vpop.f32.mrb[108].mxu0  ;;  %v5057_v30 = vadd.f32 %v3600_v41, %v2239_v56 }
 0x1e4   : > { %v3601_v13 = vpop.f32.mrb[108].mxu1  ;;  %v3502_v49 = vpop.f32.mrb[109].mxu0 }
 0x1e5   : > { %v3602_v24 = vpop.f32.mrb[109].mxu1  ;;  %v3503_v44 = vadd.f32 %v3502_v49, %v3501_v32  ;;  %v3504_v40 = vpop.f32.mrb[110].mxu0 }
 0x1e6   : > { %v3603_v47 = vadd.f32 %v3602_v24, %v3601_v13  ;;  %v3604_v38 = vpop.f32.mrb[110].mxu1  ;;  %v3505_v21 = vpop.f32.mrb[111].mxu0 }
 0x1e7   : > { %v3605_v53 = vpop.f32.mrb[111].mxu1  ;;  %v2240_v6 = vadd.f32 %v3503_v44, %v4979_v58  ;;  %v3506_v22 = vadd.f32 %v3505_v21, %v3504_v40 }
 0x1e8   : > { %v3606_v57 = vadd.f32 %v3605_v53, %v3604_v38 }
 0x1e9   : > { %v2241_v15 = vadd.f32 %v3506_v22, %v4981_v46  ;;  %v2596_v59 = vadd.f32 %v3603_v47, %v2240_v6 }
 0x1eb   : > { %v3647_v37 = vpop.f32.mrb[112].mxu0  ;;  %v2597_v3 = vadd.f32 %v3606_v57, %v2241_v15 }
 0x1ec   : > { %v3663_v26 = vpop.f32.mrb[112].mxu1  ;;  %v2851_v46 = vadd.f32 %v3647_v37, %v4991_v11 }
 0x1ed   : > { %v2867_v45 = vadd.f32 %v3663_v26, %v5039_v51  ;;  %v2802_v52 = vpop.f32.mrb[113].mxu1  ;;  %v2738_v51 = vpop.f32.mrb[113].mxu0 }
 0x1ee   : > { %v2865_v33 = vadd.f32 %v2802_v52, %v5033_v19  ;;  %v3664_v58 = vpop.f32.mrb[114].mxu1  ;;  %v2849_v5 = vadd.f32 %v2738_v51, %v4985_v62  ;;  %v3648_v19 = vpop.f32.mrb[114].mxu0  ;;  %2879 = vst [vmem:[%s5063_s23 + $0x10] sm:$0xff] %v2851_v46 }
 0x1ef   : > { %2895 = vst [vmem:[%s5063_s23 + $0x90] sm:$0xff] %v2867_v45  ;;  %v2868_v36 = vadd.f32 %v3664_v58, %v5041_v8  ;;  %v2805_v28 = vpop.f32.mrb[115].mxu1  ;;  %v2852_v17 = vadd.f32 %v3648_v19, %v4993_v1  ;;  %v2741_v31 = vpop.f32.mrb[115].mxu0 }
 0x1f0   : > { %2893 = vst [vmem:[%s5063_s23 + $0x80] sm:$0xff] %v2865_v33  ;;  %v2866_v7 = vadd.f32 %v2805_v28, %v5035_v61  ;;  %2877 = vst [vmem:[%s5063_s23] sm:$0xff] %v2849_v5  ;;  %v2850_v8 = vadd.f32 %v2741_v31, %v4987_v63 }
 0x1f1   : > { %2896 = vst [vmem:[%s5063_s23 + $0x98] sm:$0xff] %v2868_v36  ;;  %2880 = vst [vmem:[%s5063_s23 + $0x18] sm:$0xff] %v2852_v17 }
 0x1f2   : > { %2894 = vst [vmem:[%s5063_s23 + $0x88] sm:$0xff] %v2866_v7  ;;  %2878 = vst [vmem:[%s5063_s23 + $0x8] sm:$0xff] %v2850_v8 }
 0x1f3   : > { %v3651_v41 = vpop.f32.mrb[116].mxu0 }
 0x1f4   : > { %v3667_v11 = vpop.f32.mrb[116].mxu1  ;;  %v2855_v63 = vadd.f32 %v3651_v41, %v5003_v20  ;;  %v2754_v48 = vpop.f32.mrb[117].mxu0 }
 0x1f5   : > { %v2871_v61 = vadd.f32 %v3667_v11, %v2592_v29  ;;  %v2818_v25 = vpop.f32.mrb[117].mxu1  ;;  %v2853_v29 = vadd.f32 %v2754_v48, %v4997_v4  ;;  %v3652_v35 = vpop.f32.mrb[118].mxu0 }
 0x1f6   : > { %v2869_v62 = vadd.f32 %v2818_v25, %v5045_v55  ;;  %v3668_v27 = vpop.f32.mrb[118].mxu1  ;;  %2883 = vst [vmem:[%s5063_s23 + $0x30] sm:$0xff] %v2855_v63  ;;  %v2856_v55 = vadd.f32 %v3652_v35, %v5005_v9  ;;  %v2757_v18 = vpop.f32.mrb[119].mxu0 }
 0x1f7   : > { %2899 = vst [vmem:[%s5063_s23 + $0xb0] sm:$0xff] %v2871_v61  ;;  %v2872_v1 = vadd.f32 %v3668_v27, %v2593_v39  ;;  %v2821_v50 = vpop.f32.mrb[119].mxu1  ;;  %2881 = vst [vmem:[%s5063_s23 + $0x20] sm:$0xff] %v2853_v29  ;;  %v2854_v39 = vadd.f32 %v2757_v18, %v4999_v43 }
 0x1f8   : > { %2897 = vst [vmem:[%s5063_s23 + $0xa0] sm:$0xff] %v2869_v62  ;;  %v2870_v10 = vadd.f32 %v2821_v50, %v5047_v14  ;;  %2884 = vst [vmem:[%s5063_s23 + $0x38] sm:$0xff] %v2856_v55 }
 0x1f9   : > { %2900 = vst [vmem:[%s5063_s23 + $0xb8] sm:$0xff] %v2872_v1  ;;  %2882 = vst [vmem:[%s5063_s23 + $0x28] sm:$0xff] %v2854_v39 }
 0x1fa   : > { %2898 = vst [vmem:[%s5063_s23 + $0xa8] sm:$0xff] %v2870_v10 }
 0x1fb   : > { %v3655_v24 = vpop.f32.mrb[120].mxu0 }
 0x1fc   : > { %v3671_v20 = vpop.f32.mrb[120].mxu1  ;;  %v2859_v43 = vadd.f32 %v3655_v24, %v5015_v16  ;;  %v2770_v38 = vpop.f32.mrb[121].mxu0 }
 0x1fd   : > { %v2875_v14 = vadd.f32 %v3671_v20, %v2596_v59  ;;  %v2834_v13 = vpop.f32.mrb[121].mxu1  ;;  %v2857_v53 = vadd.f32 %v2770_v38, %v5009_v54  ;;  %v3656_v49 = vpop.f32.mrb[122].mxu0 }
 0x1fe   : > { %v2873_v4 = vadd.f32 %v2834_v13, %v5055_v0  ;;  %v3672_v56 = vpop.f32.mrb[122].mxu1  ;;  %2887 = vst [vmem:[%s5063_s23 + $0x50] sm:$0xff] %v2859_v43  ;;  %v2860_v0 = vadd.f32 %v3656_v49, %v5017_v34  ;;  %v2773_v57 = vpop.f32.mrb[123].mxu0 }
 0x1ff   : > { %2903 = vst [vmem:[%s5063_s23 + $0xd0] sm:$0xff] %v2875_v14  ;;  %v2876_v9 = vadd.f32 %v3672_v56, %v2597_v3  ;;  %v2837_v47 = vpop.f32.mrb[123].mxu1  ;;  %2885 = vst [vmem:[%s5063_s23 + $0x40] sm:$0xff] %v2857_v53  ;;  %v2858_v16 = vadd.f32 %v2773_v57, %v5011_v60 }
 0x200   : > { %2901 = vst [vmem:[%s5063_s23 + $0xc0] sm:$0xff] %v2873_v4  ;;  %v2874_v32 = vadd.f32 %v2837_v47, %v5057_v30  ;;  %2888 = vst [vmem:[%s5063_s23 + $0x58] sm:$0xff] %v2860_v0 }
 0x201   : > { %2904 = vst [vmem:[%s5063_s23 + $0xd8] sm:$0xff] %v2876_v9  ;;  %2886 = vst [vmem:[%s5063_s23 + $0x48] sm:$0xff] %v2858_v16 }
 0x202   : > { %2902 = vst [vmem:[%s5063_s23 + $0xc8] sm:$0xff] %v2874_v32 }
 0x203   : > { %v3659_v44 = vpop.f32.mrb[124].mxu0 }
 0x204   : > { %v2863_v30 = vadd.f32 %v3659_v44, %v5027_v23  ;;  %v2786_v54 = vpop.f32.mrb[125].mxu0 }
 0x205   : > { %v2861_v40 = vadd.f32 %v2786_v54, %v5021_v12  ;;  %v3660_v21 = vpop.f32.mrb[126].mxu0 }
 0x206   : > { %2891 = vst [vmem:[%s5063_s23 + $0x70] sm:$0xff] %v2863_v30  ;;  %v2864_v6 = vadd.f32 %v3660_v21, %v5029_v2  ;;  %v2789_v34 = vpop.f32.mrb[127].mxu0 }
 0x207   : > { %2889 = vst [vmem:[%s5063_s23 + $0x60] sm:$0xff] %v2861_v40  ;;  %v2862_v22 = vadd.f32 %v2789_v34, %v5023_v42 }
 0x208   : > { %2892 = vst [vmem:[%s5063_s23 + $0x78] sm:$0xff] %v2864_v6 }
 0x209   : > { %2890 = vst [vmem:[%s5063_s23 + $0x68] sm:$0xff] %v2862_v22 }
 0x20a PF: > { %s14_s15 = sadd.s32 1, %s3858_s15  }
 0x20b   : > { %p11_p4 = scmp.ge.s32.totalorder %s14_s15, 6  }
 0x20d   :  { %13 = sbr.rel (!%p11_p4) target bundleno = 1 (0x1), region = 69 }

</bundles_post_ra>
